<compile_context>
chip_gen: v5e
topology: v5e:2x2
jax: 0.10.0
libtpu: 0.0.40
codegen_flags: <defaults>
</compile_context>

<pallas_src>
import math

import jax
import jax.numpy as jnp
from jax import lax
from jax.experimental import pallas as pl
from jax.experimental.pallas import tpu as pltpu

IN_F = 2
HIDDEN = 64
OUT_F = 1

_INV_SQRT2 = 0.7071067811865476


def _round_up(n, m):
    return ((n + m - 1) // m) * m


def _tensorcores_per_chip():
    """Heuristic TC-per-chip count for megacore grid splitting.

    Splitting the grid on a 1-TC chip costs one extra ~0.35us step, so we err
    toward 2 when unsure.
    """
    try:
        kind = jax.devices()[0].device_kind.lower()
    except Exception:
        return 2
    if any(tag in kind for tag in ("v5 lite", "v5e", "v6 lite", "v6e")):
        return 1  # single TensorCore per chip
    if "cpu" in kind or "gpu" in kind:
        return 1
    return 2  # v7x (2 TCs), v2/v3/v4/v5p megacore, unknown TPUs


def _gelu(x, approximate=True):
    if approximate:
        # tanh approximation: the transcendental goes to the EUP (separate
        # VLIW slot), leaving only a handful of VALU ops per element.
        c = math.sqrt(2.0 / math.pi)
        return 0.5 * x * (1.0 + jnp.tanh(c * (x + 0.044715 * x * x * x)))
    # PyTorch nn.GELU() default = exact erf-based GELU (parity mode).
    return 0.5 * x * (1.0 + lax.erf(x * _INV_SQRT2))


def _make_kernel(approximate_gelu, bf16_matmul, bf16_elementwise):
    elem_dtype = jnp.bfloat16 if bf16_elementwise else jnp.float32
    mxu_dtype = jnp.bfloat16 if bf16_matmul else jnp.float32
    # Explicit matmul precision: single-pass bf16 by default, full-precision
    # multi-pass f32 in parity mode.
    dot_prec = lax.Precision.DEFAULT if bf16_matmul else lax.Precision.HIGHEST

    def kernel(x_ref, w1_ref, b1_ref, w2_ref, b2_ref, w3_ref, b3_ref,
               w4c_ref, b4_ref, o_ref):
        # x_ref: (2, tile_m)  -- features on sublanes, batch on lanes.
        xt = x_ref[...].astype(elem_dtype)
        w1 = w1_ref[...].astype(elem_dtype)     # (64, 2)  PyTorch (out, in)
        b1 = b1_ref[...].astype(elem_dtype)     # (64, 1)

        # Layer 1: K=2 contraction as two VPU broadcast FMAs (skip the MXU).
        h = w1[:, 0:1] * xt[0:1, :] + w1[:, 1:2] * xt[1:2, :] + b1
        h = _gelu(h, approximate_gelu)          # (64, tile_m)

        # Layers 2 & 3: well-shaped 64x64 @ 64xtile_m MXU matmuls
        # (bf16 operands by default, f32 accumulation).
        h = jnp.dot(w2_ref[...], h.astype(mxu_dtype),
                    preferred_element_type=jnp.float32,
                    precision=dot_prec) + b2_ref[...]
        h = _gelu(h.astype(elem_dtype), approximate_gelu)
        h = jnp.dot(w3_ref[...], h.astype(mxu_dtype),
                    preferred_element_type=jnp.float32,
                    precision=dot_prec) + b3_ref[...]
        h = _gelu(h.astype(elem_dtype), approximate_gelu)

        # Layer 4 (out_features=1): VPU multiply + cross-sublane (XLU) reduce,
        # accumulated in f32.  Result is a lane-dense (1, tile_m) row.
        y = jnp.sum(h.astype(jnp.float32) * w4c_ref[...],
                    axis=0, keepdims=True) + b4_ref[...]
        o_ref[...] = y.astype(o_ref.dtype)

    return kernel


def scorer_forward(x, params, *, tile_m=2048, approximate_gelu=True,
                   bf16_matmul=True, bf16_elementwise=False,
                   x_feature_major=False):
    """Forward pass of Scorer.

    x: (N, 2) float32 (or (2, N) if x_feature_major=True).
    params: PyTorch layout (W: (out, in), b: (out,)).
    Returns (N, 1) float32.

    Defaults are the fast path (tanh GELU + bf16 MXU).  For strict PyTorch
    nn.GELU / f32-matmul parity use approximate_gelu=False, bf16_matmul=False.
    """
    if x_feature_major:
        F, N = x.shape
        xt = x
    else:
        N, F = x.shape
        xt = x.T  # TODO(synk): producers holding (2, N) should pass x_feature_major=True to skip this copy.
    assert F == IN_F
    w1, b1, w2, b2, w3, b3, w4, b4 = params

    # --- Batch tiling (rows per grid step), lane axis kept dense (mult of 128).
    assert tile_m % 128 == 0
    n_pad128 = _round_up(max(N, 1), 128)
    tile_m = max(128, min(tile_m, n_pad128))
    # v7x megacore: make sure "parallel" has >= 2 grid steps to shard across
    # the 2 TensorCores (harmless single extra step on 1-TC chips).
    if _tensorcores_per_chip() >= 2 and n_pad128 // tile_m < 2 and n_pad128 >= 256:
        tile_m = _round_up(n_pad128 // 2, 128)
    n_pad = _round_up(N, tile_m)
    grid = (n_pad // tile_m,)

    # Feature-major input, zero-padded along the batch axis.
    xt = jnp.pad(xt, ((0, 0), (0, n_pad - N)))            # (2, n_pad)

    mxu_dtype = jnp.bfloat16 if bf16_matmul else jnp.float32
    w2c = w2.astype(mxu_dtype)
    w3c = w3.astype(mxu_dtype)

    # Biases as columns; W4 (1,64) as a (64,1) column for the VPU reduce.
    b1c = b1.reshape(HIDDEN, 1)
    b2c = b2.reshape(HIDDEN, 1)
    b3c = b3.reshape(HIDDEN, 1)
    w4c = w4.reshape(HIDDEN, 1)
    b4c = b4.reshape(1, 1)

    def full_spec(arr):
        # Full-array block, constant index -> stays VMEM-resident across steps.
        return pl.BlockSpec(arr.shape, lambda i: (0, 0))

    out = pl.pallas_call(
        _make_kernel(approximate_gelu, bf16_matmul, bf16_elementwise),
        out_shape=jax.ShapeDtypeStruct((1, n_pad), jnp.float32),
        grid_spec=pltpu.PrefetchScalarGridSpec(
            num_scalar_prefetch=0,
            grid=grid,
            in_specs=[
                pl.BlockSpec((IN_F, tile_m), lambda i: (0, i)),   # x tile
                full_spec(w1), full_spec(b1c),
                full_spec(w2c), full_spec(b2c),
                full_spec(w3c), full_spec(b3c),
                full_spec(w4c), full_spec(b4c),
            ],
            out_specs=pl.BlockSpec((1, tile_m), lambda i: (0, i)),  # lane-dense
        ),
        compiler_params=pltpu.CompilerParams(
            dimension_semantics=("parallel",)),
    )(xt, w1, b1c, w2c, b2c, w3c, b3c, w4c, b4c)

    return out[0, :N].reshape(N, OUT_F)


def init_params(key):
    """Deterministic init matching PyTorch Linear shapes: W (out, in), b (out,)."""
    ks = jax.random.split(key, 8)

    def lin(kw, kb, fan_in, fan_out):
        bound = 1.0 / math.sqrt(fan_in)
        w = jax.random.uniform(kw, (fan_out, fan_in), jnp.float32, -bound, bound)
        b = jax.random.uniform(kb, (fan_out,), jnp.float32, -bound, bound)
        return w, b

    w1, b1 = lin(ks[0], ks[1], IN_F, HIDDEN)
    w2, b2 = lin(ks[2], ks[3], HIDDEN, HIDDEN)
    w3, b3 = lin(ks[4], ks[5], HIDDEN, HIDDEN)
    w4, b4 = lin(ks[6], ks[7], HIDDEN, OUT_F)
    return (w1, b1, w2, b2, w3, b3, w4, b4)


def scorer_reference(x, params, *, approximate_gelu=False):
    """Pure-JAX reference, explicit full-precision f32 matmuls."""
    w1, b1, w2, b2, w3, b3, w4, b4 = params
    prec = lax.Precision.HIGHEST
    h = _gelu(jnp.dot(x, w1.T, precision=prec) + b1, approximate_gelu)
    h = _gelu(jnp.dot(h, w2.T, precision=prec) + b2, approximate_gelu)
    h = _gelu(jnp.dot(h, w3.T, precision=prec) + b3, approximate_gelu)
    return jnp.dot(h, w4.T, precision=prec) + b4


if __name__ == "__main__":
    key = jax.random.PRNGKey(0)
    k_param, k_x1, k_x2 = jax.random.split(key, 3)

    params = init_params(k_param)

    # --- Parity mode: exact erf GELU + full-precision f32 matmuls.
    x_small = jax.random.normal(k_x1, (16, IN_F), jnp.float32)
    out_parity = jax.block_until_ready(
        scorer_forward(x_small, params,
                       approximate_gelu=False, bf16_matmul=False))
    ref_exact = scorer_reference(x_small, params, approximate_gelu=False)
    assert out_parity.shape == (16, OUT_F)
    assert jnp.allclose(out_parity, ref_exact, atol=1e-5, rtol=1e-5), \
        "parity-mode mismatch vs exact JAX reference (N=16)"

    # --- Fast mode (defaults): tanh GELU + bf16 MXU matmuls.  Ragged N
    # exercises zero-padding, the slice path, and the megacore grid split.
    x_ragged = jax.random.normal(k_x2, (300, IN_F), jnp.float32)
    out_fast = jax.block_until_ready(scorer_forward(x_ragged, params))
    ref_approx = scorer_reference(x_ragged, params, approximate_gelu=True)
    assert out_fast.shape == (300, OUT_F)
    assert jnp.allclose(out_fast, ref_approx, atol=2e-2, rtol=2e-2), \
        "fast-mode mismatch vs tanh-GELU f32 reference (N=300)"

    print("KERNEL_OK")
</pallas_src>

<mosaic_0001>
module attributes {stable_mosaic.version = 11 : i64} {
  func.func @kernel(%arg0: i32, %arg1: memref<2x128xf32, #tpu.memory_space<vmem>>, %arg2: memref<64x2xf32, #tpu.memory_space<vmem>>, %arg3: memref<64x1xf32, #tpu.memory_space<vmem>>, %arg4: memref<64x64xf32, #tpu.memory_space<vmem>>, %arg5: memref<64x1xf32, #tpu.memory_space<vmem>>, %arg6: memref<64x64xf32, #tpu.memory_space<vmem>>, %arg7: memref<64x1xf32, #tpu.memory_space<vmem>>, %arg8: memref<64x1xf32, #tpu.memory_space<vmem>>, %arg9: memref<1x1xf32, #tpu.memory_space<vmem>>, %arg10: memref<1x128xf32, #tpu.memory_space<vmem>>) attributes {dimension_semantics = [#tpu.dimension_semantics<parallel>], iteration_bounds = array<i64: 1>, scalar_prefetch = 0 : i64, scratch_operands = 0 : i64, tpu.core_type = #tpu.core_type<tc>, window_params = [{transform_indices = @transform_0, window_bounds = array<i64: 2, 128>}, {pipeline_mode = #tpu.pipeline_mode<synchronous>, transform_indices = @transform_1, window_bounds = array<i64: 64, 2>}, {pipeline_mode = #tpu.pipeline_mode<synchronous>, transform_indices = @transform_2, window_bounds = array<i64: 64, 1>}, {pipeline_mode = #tpu.pipeline_mode<synchronous>, transform_indices = @transform_3, window_bounds = array<i64: 64, 64>}, {pipeline_mode = #tpu.pipeline_mode<synchronous>, transform_indices = @transform_4, window_bounds = array<i64: 64, 1>}, {pipeline_mode = #tpu.pipeline_mode<synchronous>, transform_indices = @transform_5, window_bounds = array<i64: 64, 64>}, {pipeline_mode = #tpu.pipeline_mode<synchronous>, transform_indices = @transform_6, window_bounds = array<i64: 64, 1>}, {pipeline_mode = #tpu.pipeline_mode<synchronous>, transform_indices = @transform_7, window_bounds = array<i64: 64, 1>}, {pipeline_mode = #tpu.pipeline_mode<synchronous>, transform_indices = @transform_8, window_bounds = array<i64: 1, 1>}, {transform_indices = @transform_9, window_bounds = array<i64: 1, 128>}]} {
    %c0 = arith.constant 0 : index
    %c0_0 = arith.constant 0 : index
    %0 = vector.load %arg1[%c0, %c0_0] : memref<2x128xf32, #tpu.memory_space<vmem>>, vector<2x128xf32>
    %c0_1 = arith.constant 0 : index
    %c0_2 = arith.constant 0 : index
    %1 = vector.load %arg2[%c0_1, %c0_2] : memref<64x2xf32, #tpu.memory_space<vmem>>, vector<64x2xf32>
    %c0_3 = arith.constant 0 : index
    %c0_4 = arith.constant 0 : index
    %2 = vector.load %arg3[%c0_3, %c0_4] : memref<64x1xf32, #tpu.memory_space<vmem>>, vector<64x1xf32>
    %3 = vector.extract_strided_slice %1 {offsets = [0, 0], sizes = [64, 1], strides = [1, 1]} : vector<64x2xf32> to vector<64x1xf32>
    %4 = vector.extract_strided_slice %0 {offsets = [0, 0], sizes = [1, 128], strides = [1, 1]} : vector<2x128xf32> to vector<1x128xf32>
    %5 = vector.broadcast %3 : vector<64x1xf32> to vector<64x128xf32>
    %6 = vector.broadcast %4 : vector<1x128xf32> to vector<64x128xf32>
    %7 = arith.mulf %5, %6 : vector<64x128xf32>
    %8 = vector.extract_strided_slice %1 {offsets = [0, 1], sizes = [64, 1], strides = [1, 1]} : vector<64x2xf32> to vector<64x1xf32>
    %9 = vector.extract_strided_slice %0 {offsets = [1, 0], sizes = [1, 128], strides = [1, 1]} : vector<2x128xf32> to vector<1x128xf32>
    %10 = vector.broadcast %8 : vector<64x1xf32> to vector<64x128xf32>
    %11 = vector.broadcast %9 : vector<1x128xf32> to vector<64x128xf32>
    %12 = arith.mulf %10, %11 : vector<64x128xf32>
    %13 = arith.addf %7, %12 : vector<64x128xf32>
    %14 = vector.broadcast %2 : vector<64x1xf32> to vector<64x128xf32>
    %15 = arith.addf %13, %14 : vector<64x128xf32>
    %cst = arith.constant 5.000000e-01 : f32
    %16 = vector.broadcast %cst : f32 to vector<64x128xf32>
    %17 = arith.mulf %16, %15 : vector<64x128xf32>
    %cst_5 = arith.constant 0.707106769 : f32
    %18 = vector.broadcast %cst_5 : f32 to vector<64x128xf32>
    %19 = arith.mulf %15, %18 : vector<64x128xf32>
    %20 = math.erf %19 : vector<64x128xf32>
    %cst_6 = arith.constant 1.000000e+00 : f32
    %21 = vector.broadcast %cst_6 : f32 to vector<64x128xf32>
    %22 = arith.addf %21, %20 : vector<64x128xf32>
    %23 = arith.mulf %17, %22 : vector<64x128xf32>
    %c0_7 = arith.constant 0 : index
    %c0_8 = arith.constant 0 : index
    %24 = vector.load %arg4[%c0_7, %c0_8] : memref<64x64xf32, #tpu.memory_space<vmem>>, vector<64x64xf32>
    %cst_9 = arith.constant dense<0.000000e+00> : vector<64x128xf32>
    %25 = tpu.matmul %24, %23, %cst_9 {dimension_numbers = #tpu.dot_dimension_numbers<[1], [0], [0], [1], [0, 0, 1, 1], [], []>, precision = #tpu.contract_precision<fp32>} : vector<64x64xf32>, vector<64x128xf32>, vector<64x128xf32> -> vector<64x128xf32>
    %c0_10 = arith.constant 0 : index
    %c0_11 = arith.constant 0 : index
    %26 = vector.load %arg5[%c0_10, %c0_11] : memref<64x1xf32, #tpu.memory_space<vmem>>, vector<64x1xf32>
    %27 = vector.broadcast %26 : vector<64x1xf32> to vector<64x128xf32>
    %28 = arith.addf %25, %27 : vector<64x128xf32>
    %cst_12 = arith.constant 5.000000e-01 : f32
    %29 = vector.broadcast %cst_12 : f32 to vector<64x128xf32>
    %30 = arith.mulf %29, %28 : vector<64x128xf32>
    %cst_13 = arith.constant 0.707106769 : f32
    %31 = vector.broadcast %cst_13 : f32 to vector<64x128xf32>
    %32 = arith.mulf %28, %31 : vector<64x128xf32>
    %33 = math.erf %32 : vector<64x128xf32>
    %cst_14 = arith.constant 1.000000e+00 : f32
    %34 = vector.broadcast %cst_14 : f32 to vector<64x128xf32>
    %35 = arith.addf %34, %33 : vector<64x128xf32>
    %36 = arith.mulf %30, %35 : vector<64x128xf32>
    %c0_15 = arith.constant 0 : index
    %c0_16 = arith.constant 0 : index
    %37 = vector.load %arg6[%c0_15, %c0_16] : memref<64x64xf32, #tpu.memory_space<vmem>>, vector<64x64xf32>
    %cst_17 = arith.constant dense<0.000000e+00> : vector<64x128xf32>
    %38 = tpu.matmul %37, %36, %cst_17 {dimension_numbers = #tpu.dot_dimension_numbers<[1], [0], [0], [1], [0, 0, 1, 1], [], []>, precision = #tpu.contract_precision<fp32>} : vector<64x64xf32>, vector<64x128xf32>, vector<64x128xf32> -> vector<64x128xf32>
    %c0_18 = arith.constant 0 : index
    %c0_19 = arith.constant 0 : index
    %39 = vector.load %arg7[%c0_18, %c0_19] : memref<64x1xf32, #tpu.memory_space<vmem>>, vector<64x1xf32>
    %40 = vector.broadcast %39 : vector<64x1xf32> to vector<64x128xf32>
    %41 = arith.addf %38, %40 : vector<64x128xf32>
    %cst_20 = arith.constant 5.000000e-01 : f32
    %42 = vector.broadcast %cst_20 : f32 to vector<64x128xf32>
    %43 = arith.mulf %42, %41 : vector<64x128xf32>
    %cst_21 = arith.constant 0.707106769 : f32
    %44 = vector.broadcast %cst_21 : f32 to vector<64x128xf32>
    %45 = arith.mulf %41, %44 : vector<64x128xf32>
    %46 = math.erf %45 : vector<64x128xf32>
    %cst_22 = arith.constant 1.000000e+00 : f32
    %47 = vector.broadcast %cst_22 : f32 to vector<64x128xf32>
    %48 = arith.addf %47, %46 : vector<64x128xf32>
    %49 = arith.mulf %43, %48 : vector<64x128xf32>
    %c0_23 = arith.constant 0 : index
    %c0_24 = arith.constant 0 : index
    %50 = vector.load %arg8[%c0_23, %c0_24] : memref<64x1xf32, #tpu.memory_space<vmem>>, vector<64x1xf32>
    %51 = vector.broadcast %50 : vector<64x1xf32> to vector<64x128xf32>
    %52 = arith.mulf %49, %51 : vector<64x128xf32>
    %cst_25 = arith.constant dense<0.000000e+00> : vector<128xf32>
    %53 = vector.multi_reduction <add>, %52, %cst_25 [0] : vector<64x128xf32> to vector<128xf32>
    %54 = vector.shape_cast %53 : vector<128xf32> to vector<1x128xf32>
    %c0_26 = arith.constant 0 : index
    %c0_27 = arith.constant 0 : index
    %55 = vector.load %arg9[%c0_26, %c0_27] : memref<1x1xf32, #tpu.memory_space<vmem>>, vector<1x1xf32>
    %56 = vector.broadcast %55 : vector<1x1xf32> to vector<1x128xf32>
    %57 = arith.addf %54, %56 : vector<1x128xf32>
    %c0_28 = arith.constant 0 : index
    %c0_29 = arith.constant 0 : index
    %58 = vector.load %arg10[%c0_28, %c0_29] : memref<1x128xf32, #tpu.memory_space<vmem>>, vector<1x128xf32>
    tpu.vector_store %arg10[%c0_28, %c0_29], %57 {strides = array<i32>} : memref<1x128xf32, #tpu.memory_space<vmem>>, vector<1x128xf32>,
    return
  }
  func.func @transform_0(%arg0: i32) -> (i32, i32) {
    %c0_i32 = arith.constant 0 : i32
    %c0_i32_0 = arith.constant 0 : i32
    return %c0_i32, %arg0 : i32, i32
  }
  func.func @transform_1(%arg0: i32) -> (i32, i32) {
    %c0_i32 = arith.constant 0 : i32
    %c0_i32_0 = arith.constant 0 : i32
    %c0_i32_1 = arith.constant 0 : i32
    return %c0_i32, %c0_i32_0 : i32, i32
  }
  func.func @transform_2(%arg0: i32) -> (i32, i32) {
    %c0_i32 = arith.constant 0 : i32
    %c0_i32_0 = arith.constant 0 : i32
    %c0_i32_1 = arith.constant 0 : i32
    return %c0_i32, %c0_i32_0 : i32, i32
  }
  func.func @transform_3(%arg0: i32) -> (i32, i32) {
    %c0_i32 = arith.constant 0 : i32
    %c0_i32_0 = arith.constant 0 : i32
    %c0_i32_1 = arith.constant 0 : i32
    return %c0_i32, %c0_i32_0 : i32, i32
  }
  func.func @transform_4(%arg0: i32) -> (i32, i32) {
    %c0_i32 = arith.constant 0 : i32
    %c0_i32_0 = arith.constant 0 : i32
    %c0_i32_1 = arith.constant 0 : i32
    return %c0_i32, %c0_i32_0 : i32, i32
  }
  func.func @transform_5(%arg0: i32) -> (i32, i32) {
    %c0_i32 = arith.constant 0 : i32
    %c0_i32_0 = arith.constant 0 : i32
    %c0_i32_1 = arith.constant 0 : i32
    return %c0_i32, %c0_i32_0 : i32, i32
  }
  func.func @transform_6(%arg0: i32) -> (i32, i32) {
    %c0_i32 = arith.constant 0 : i32
    %c0_i32_0 = arith.constant 0 : i32
    %c0_i32_1 = arith.constant 0 : i32
    return %c0_i32, %c0_i32_0 : i32, i32
  }
  func.func @transform_7(%arg0: i32) -> (i32, i32) {
    %c0_i32 = arith.constant 0 : i32
    %c0_i32_0 = arith.constant 0 : i32
    %c0_i32_1 = arith.constant 0 : i32
    return %c0_i32, %c0_i32_0 : i32, i32
  }
  func.func @transform_8(%arg0: i32) -> (i32, i32) {
    %c0_i32 = arith.constant 0 : i32
    %c0_i32_0 = arith.constant 0 : i32
    %c0_i32_1 = arith.constant 0 : i32
    return %c0_i32, %c0_i32_0 : i32, i32
  }
  func.func @transform_9(%arg0: i32) -> (i32, i32) {
    %c0_i32 = arith.constant 0 : i32
    %c0_i32_0 = arith.constant 0 : i32
    return %c0_i32, %arg0 : i32, i32
  }
}

</mosaic_0001>

<bundles_post_ra>
// kernel: tpu_custom_call.1
= control target key start
LH: loop header
LB: loop body
LE: loop exit
PB: predicated region body
PF: predicated region fallthrough
CT: control target
= control target key end

     0   :  { %s4006_s0 = inlined_call_operand.vmem [shape: f32[2,128], index: 0, kind: input, shape index: {}]   ;;  %s4007_s1 = inlined_call_operand.vmem [shape: f32[64,2], index: 1, kind: input, shape index: {}]   ;;  %s4008_s2 = inlined_call_operand.vmem [shape: f32[64,1], index: 2, kind: input, shape index: {}]   ;;  %s4009_s3 = inlined_call_operand.vmem [shape: f32[64,64], index: 3, kind: input, shape index: {}]   ;;  %s4010_s4 = inlined_call_operand.vmem [shape: f32[64,1], index: 4, kind: input, shape index: {}]   ;;  %s4011_s5 = inlined_call_operand.vmem [shape: f32[64,64], index: 5, kind: input, shape index: {}]   ;;  %s4012_s6 = inlined_call_operand.vmem [shape: f32[64,1], index: 6, kind: input, shape index: {}]   ;;  %s4013_s7 = inlined_call_operand.vmem [shape: f32[64,1], index: 7, kind: input, shape index: {}]   ;;  %s4014_s8 = inlined_call_operand.<no memory space> [shape: f32[1,1], index: 8, kind: input, shape index: {}]   ;;  %s4015_s9 = inlined_call_operand.hbm [shape: f32[1,128], index: 9, kind: output, shape index: {}]  }
   0x1   :  { %v14_v0 = vstv %s4014_s8 }
   0x2   :  { %15 = vst [vmem:[#allocation2] sm:$0x1] %v14_v0 }
   0x3   :  { %v43_v1 = vld [vmem:[%s4007_s1 + $0x38] sm:$0xff]  ;;  %v42_v2 = vld [vmem:[%s4007_s1 + $0x30] sm:$0xff]  ;;  %v41_v3 = vld [vmem:[%s4007_s1 + $0x28] sm:$0xff]  ;;  %v2527_v4 = vmov 0  }
   0x4   :  { %2448 = vset.pattern.permute.xlu2 %v2527_v4  ;;  %2446 = vset.pattern.permute.xlu1 %v2527_v4 }
   0x5   :  { %2444 = vset.pattern.permute.xlu0 %v2527_v4  ;;  %84 = vperm.xlu1 %2446, %v42_v2  }
   0x6   :  { %16 = vsyncpa [#allocation4], 0  ;;  %89 = vperm.xlu0 %2444, %v43_v1   ;;  %79 = vperm.xlu2 %2448, %v41_v3   ;;  %v2528_v5 = vmov 1   ;;  %v40_v6 = vld [vmem:[%s4007_s1 + $0x20] sm:$0xff]  ;;  %v51_v7 = vld [vmem:[%s4008_s2 + $0x38] sm:$0xff]  ;;  %s2408_s22 = sshll.u32 %s4015_s9, 4  ;;  %s2409_s22 = int_to_ptr.hbm [resolvable:$true] %s2408_s22 }
   0x7   :  { %v39_v8 = vld [vmem:[%s4007_s1 + $0x18] sm:$0xff]  ;;  %v50_v9 = vld [vmem:[%s4008_s2 + $0x30] sm:$0xff]  ;;  %v49_v11 = vld [vmem:[%s4008_s2 + $0x28] sm:$0xff] }
   0x8   :  { %v38_v10 = vld [vmem:[%s4007_s1 + $0x10] sm:$0xff]  ;;  %v37_v12 = vld [vmem:[%s4007_s1 + $0x8] sm:$0xff]  ;;  %v48_v13 = vld [vmem:[%s4008_s2 + $0x20] sm:$0xff] }
   0x9   :  { %v36_v14 = vld [vmem:[%s4007_s1] sm:$0xff]  ;;  %v47_v15 = vld [vmem:[%s4008_s2 + $0x18] sm:$0xff]  ;;  %v46_v16 = vld [vmem:[%s4008_s2 + $0x10] sm:$0xff] }
   0xa   :  { %v44_v17 = vld [vmem:[%s4008_s2] sm:$0xff]  ;;  %v45_v18 = vld [vmem:[%s4008_s2 + $0x8] sm:$0xff]  ;;  %v565_v19 = vld [vmem:[%s4010_s4 + $0x38] sm:$0xff] }
   0xb   :  { %v561_v20 = vld [vmem:[%s4010_s4 + $0x18] sm:$0xff]  ;;  %v564_v21 = vld [vmem:[%s4010_s4 + $0x30] sm:$0xff]  ;;  %v563_v22 = vld [vmem:[%s4010_s4 + $0x28] sm:$0xff] }
   0xc   :  { %v558_v23 = vld [vmem:[%s4010_s4] sm:$0xff]  ;;  %v560_v25 = vld [vmem:[%s4010_s4 + $0x10] sm:$0xff]  ;;  %v559_v27 = vld [vmem:[%s4010_s4 + $0x8] sm:$0xff] }
   0xd   :  { %2447 = vset.pattern.permute.xlu1 %v2528_v5  ;;  %v562_v24 = vld [vmem:[%s4010_s4 + $0x20] sm:$0xff]  ;;  %v1447_v26 = vld [vmem:[%s4012_s6 + $0x10] sm:$0xff]  ;;  %v1450_v29 = vld [vmem:[%s4012_s6 + $0x28] sm:$0xff] }
   0xe   :  { %2445 = vset.pattern.permute.xlu0 %v2528_v5  ;;  %2449 = vset.pattern.permute.xlu2 %v2528_v5  ;;  %v1445_v28 = vld [vmem:[%s4012_s6] sm:$0xff]  ;;  %v1446_v30 = vld [vmem:[%s4012_s6 + $0x8] sm:$0xff]  ;;  %v1448_v32 = vld [vmem:[%s4012_s6 + $0x18] sm:$0xff] }
   0xf   :  { %130 = vperm.xlu0 %2445, %v43_v1   ;;  %126 = vperm.xlu1 %2447, %v42_v2   ;;  %v2323_v33 = vld [vmem:[%s4013_s7] sm:$0xff]  ;;  %v1451_v36 = vld [vmem:[%s4012_s6 + $0x30] sm:$0xff]  ;;  %v2326_v37 = vld [vmem:[%s4013_s7 + $0x18] sm:$0xff] }
  0x10   :  { %122 = vperm.xlu2 %2449, %v41_v3   ;;  %v1449_v34 = vld [vmem:[%s4012_s6 + $0x20] sm:$0xff]  ;;  %v1452_v38 = vld [vmem:[%s4012_s6 + $0x38] sm:$0xff]  ;;  %v2324_v39 = vld [vmem:[%s4013_s7 + $0x8] sm:$0xff] }
  0x11   :  { %v2329_v40 = vld [vmem:[%s4013_s7 + $0x30] sm:$0xff]  ;;  %v2327_v45 = vld [vmem:[%s4013_s7 + $0x20] sm:$0xff]  ;;  %v2328_v46 = vld [vmem:[%s4013_s7 + $0x28] sm:$0xff] }
  0x12   :  { %v2325_v42 = vld [vmem:[%s4013_s7 + $0x10] sm:$0xff]  ;;  %v35_v50 = vld [vmem:[%s4006_s0] sm:$0x3]  ;;  %v2330_v54 = vld [vmem:[%s4013_s7 + $0x38] sm:$0xff] }
  0x13   :  { %v2707_v51 = vperm.slane %v35_v50, 1  ;;  %v2709_v52 = vperm.slane %v35_v50, 0  ;;  %v2392_v55 = vld [vmem:[#allocation2] sm:$0x1] }
  0x17   :  { %2450 = vset.pattern.permute.xlu1 %v2527_v4  ;;  %118 = vperm.xlu0 %2445, %v40_v6  }
  0x18   :  { %2451 = vset.pattern.permute.xlu2 %v2527_v4  ;;  %187 = vperm.xlu1 %2450, %v51_v7  }
  0x19   :  { %74 = vperm.xlu2 %2451, %v40_v6  }
  0x1f   :  { %114 = vperm.xlu0 %2445, %v39_v8  }
  0x20   :  { %182 = vperm.xlu1 %2450, %v50_v9  }
  0x21   :  { %69 = vperm.xlu2 %2451, %v39_v8  }
  0x27   :  { %110 = vperm.xlu0 %2445, %v38_v10  }
  0x28   :  { %177 = vperm.xlu1 %2450, %v49_v11  }
  0x29   :  { %64 = vperm.xlu2 %2451, %v38_v10  }
  0x2f   :  { %106 = vperm.xlu0 %2445, %v37_v12  }
  0x30   :  { %172 = vperm.xlu1 %2450, %v48_v13  }
  0x31   :  { %59 = vperm.xlu2 %2451, %v37_v12  }
  0x37   :  { %102 = vperm.xlu0 %2445, %v36_v14  }
  0x38   :  { %167 = vperm.xlu1 %2450, %v47_v15  }
  0x39   :  { %54 = vperm.xlu2 %2451, %v36_v14  }
  0x3f   :  { %2452 = vset.pattern.permute.xlu0 %v2527_v4 }
  0x40   :  { %162 = vperm.xlu1 %2450, %v46_v16   ;;  %152 = vperm.xlu0 %2452, %v44_v17  }
  0x41   :  { %157 = vperm.xlu2 %2451, %v45_v18  }
  0x48   :  { %603 = vperm.xlu1 %2450, %v565_v19   ;;  %583 = vperm.xlu0 %2452, %v561_v20  }
  0x49   :  { %598 = vperm.xlu2 %2451, %v564_v21  }
  0x50   :  { %593 = vperm.xlu1 %2450, %v563_v22   ;;  %568 = vperm.xlu0 %2452, %v558_v23  }
  0x51   :  { %588 = vperm.xlu2 %2451, %v562_v24  }
  0x58   :  { %578 = vperm.xlu1 %2450, %v560_v25   ;;  %1465 = vperm.xlu0 %2452, %v1447_v26  }
  0x59   :  { %573 = vperm.xlu2 %2451, %v559_v27  }
  0x60   :  { %1455 = vperm.xlu1 %2450, %v1445_v28   ;;  %1480 = vperm.xlu0 %2452, %v1450_v29   ;;  %v80_v31 = vpop.permute.xlu2 %79 }
  0x61   :  { %1460 = vperm.xlu2 %2451, %v1446_v30   ;;  %v98_v10 = vmul.f32 %v2709_v52, %v80_v31 }
  0x68   :  { %1470 = vperm.xlu1 %2450, %v1448_v32   ;;  %2333 = vperm.xlu0 %2452, %v2323_v33  }
  0x69   :  { %1475 = vperm.xlu2 %2451, %v1449_v34  }
  0x6a   :  { %v123_v35 = vpop.permute.xlu2 %122 }
  0x6b   :  { %v139_v11 = vmul.f32 %v2707_v51, %v123_v35 }
  0x6d   :  { %v147_v21 = vadd.f32 %v139_v11, %v98_v10 }
  0x70   :  { %1485 = vperm.xlu1 %2450, %v1451_v36   ;;  %2348 = vperm.xlu0 %2452, %v2326_v37  }
  0x71   :  { %1490 = vperm.xlu2 %2451, %v1452_v38  }
  0x73   :  { %v2691_v41 = vpop.permute.xlu2 %74 }
  0x74   :  { %v97_v37 = vmul.f32 %v2709_v52, %v2691_v41 }
  0x77   :  { %v85_v43 = vpop.permute.xlu1 %84 }
  0x78   :  { %2338 = vperm.xlu1 %2450, %v2324_v39   ;;  %2363 = vperm.xlu0 %2452, %v2329_v40   ;;  %v90_v44 = vpop.permute.xlu0 %89  ;;  %v99_v0 = vmul.f32 %v2709_v52, %v85_v43 }
  0x79   :  { %2343 = vperm.xlu2 %2451, %v2325_v42   ;;  %v100_v56 = vmul.f32 %v2709_v52, %v90_v44 }
  0x7b   :  { %v2702_v47 = vpop.permute.xlu2 %69 }
  0x80   :  { %2353 = vperm.xlu1 %2450, %v2327_v45  }
  0x81   :  { %2358 = vperm.xlu2 %2451, %v2328_v46   ;;  %v131_v48 = vpop.permute.xlu0 %130  ;;  %v127_v49 = vpop.permute.xlu1 %126 }
  0x82   :  { %v141_v53 = vmul.f32 %v2707_v51, %v131_v48  ;;  %v140_v62 = vmul.f32 %v2707_v51, %v127_v49 }
  0x83   :  { %v65_v59 = vpop.permute.xlu2 %64 }
  0x84   :  { %v149_v58 = vadd.f32 %v141_v53, %v100_v56  ;;  %v148_v4 = vadd.f32 %v140_v62, %v99_v0  ;;  %v95_v22 = vmul.f32 %v2709_v52, %v65_v59 }
  0x88   :  { %2368 = vperm.xlu1 %2450, %v2330_v54  }
  0x89   :  { %2395 = vperm.xlu2 %2451, %v2392_v55   ;;  %v119_v57 = vpop.permute.xlu0 %118 }
  0x8a   :  { %v188_v60 = vpop.permute.xlu1 %187  ;;  %v138_v38 = vmul.f32 %v2707_v51, %v119_v57 }
  0x8b   :  { %v2716_v61 = vadd.f32 %v188_v60, %v149_v58  ;;  %v60_v9 = vpop.permute.xlu2 %59 }
  0x8c   :  { %v94_v55 = vmul.f32 %v2709_v52, %v60_v9  ;;  %v146_v56 = vadd.f32 %v138_v38, %v97_v37 }
  0x8d   :  { %v2720_v63 = vmul.f32 0.70710677, %v2716_v61 }
  0x8f   :  { %v494_v1 = vmul.f32 %v2720_v63, %v2720_v63 }
  0x91   :  { %v2725_v2 = vmin.f32 %v494_v1, 16.0  ;;  %v2727_v3 = vpop.permute.xlu0 %114 }
  0x92   :  { %v183_v5 = vpop.permute.xlu1 %182 }
  0x93   :  { %v496_v6 = vmul.f32 2.1237322e-06, %v2725_v2  ;;  %v507_v7 = vmul.f32 3.8918573e-05, %v2725_v2  ;;  %v2731_v8 = vadd.f32 %v183_v5, %v148_v4  ;;  %v55_v35 = vpop.permute.xlu2 %54 }
  0x95   :  { %v497_v12 = vadd.f32 0.00028619796, %v496_v6  ;;  %v508_v13 = vadd.f32 0.001143296, %v507_v7  ;;  %v2736_v14 = vmul.f32 0.70710677, %v2731_v8 }
  0x97   :  { %v498_v15 = vmul.f32 %v497_v12, %v2725_v2  ;;  %v509_v16 = vmul.f32 %v508_v13, %v2725_v2  ;;  %v454_v17 = vmul.f32 %v2736_v14, %v2736_v14 }
  0x99   :  { %v499_v18 = vadd.f32 0.0036580483, %v498_v15  ;;  %v510_v19 = vadd.f32 0.014752088, %v509_v16  ;;  %v111_v20 = vpop.permute.xlu0 %110  ;;  %v2743_v23 = vmin.f32 %v454_v17, 16.0 }
  0x9a   :  { %v136_v24 = vmul.f32 %v2707_v51, %v111_v20  ;;  %v178_v25 = vpop.permute.xlu1 %177  ;;  %v2791_v20 = vmul.f32 0.5, %v2716_v61 }
  0x9b   :  { %v511_v26 = vmul.f32 %v510_v19, %v2725_v2  ;;  %v2747_v27 = vadd.f32 %v178_v25, %v147_v21  ;;  %v500_v28 = vmul.f32 %v499_v18, %v2725_v2  ;;  %v456_v29 = vmul.f32 2.1237322e-06, %v2743_v23  ;;  %v158_v12 = vpop.permute.xlu2 %157 }
  0x9c   :  { %v467_v30 = vmul.f32 3.8918573e-05, %v2743_v23  ;;  %v2752_v31 = vadd.f32 %v136_v24, %v95_v22  ;;  %v96_v19 = vmul.f32 %v2709_v52, %v2702_v47  ;;  %v93_v24 = vmul.f32 %v2709_v52, %v55_v35 }
  0x9d   :  { %v512_v32 = vadd.f32 0.112945676, %v511_v26  ;;  %v457_v33 = vadd.f32 0.00028619796, %v456_v29  ;;  %v2755_v36 = vmul.f32 0.70710677, %v2747_v27 }
  0x9e   :  { %v468_v34 = vadd.f32 0.001143296, %v467_v30  ;;  %v501_v40 = vadd.f32 0.05243302, %v500_v28  ;;  %v137_v30 = vmul.f32 %v2707_v51, %v2727_v3 }
  0x9f   :  { %v513_v39 = vmul.f32 %v512_v32, %v2725_v2  ;;  %v458_v42 = vmul.f32 %v457_v33, %v2743_v23  ;;  %v414_v44 = vmul.f32 %v2755_v36, %v2755_v36 }
  0xa0   :  { %v469_v43 = vmul.f32 %v468_v34, %v2743_v23  ;;  %v502_v57 = vmul.f32 %v501_v40, %v2725_v2 }
  0xa1   :  { %v514_v45 = vadd.f32 0.4994258, %v513_v39  ;;  %v107_v46 = vpop.permute.xlu0 %106  ;;  %v459_v48 = vadd.f32 0.0036580483, %v458_v42  ;;  %v2765_v50 = vmin.f32 %v414_v44, 16.0 }
  0xa2   :  { %v470_v49 = vadd.f32 0.014752088, %v469_v43  ;;  %v135_v41 = vmul.f32 %v2707_v51, %v107_v46  ;;  %v173_v53 = vpop.permute.xlu1 %172  ;;  %v503_v9 = vadd.f32 0.18741608, %v502_v57 }
  0xa3   :  { %v515_v54 = vmul.f32 %v514_v45, %v2725_v2  ;;  %v460_v58 = vmul.f32 %v459_v48, %v2743_v23  ;;  %v416_v60 = vmul.f32 2.1237322e-06, %v2765_v50  ;;  %v427_v0 = vmul.f32 3.8918573e-05, %v2765_v50 }
  0xa4   :  { %v471_v59 = vmul.f32 %v470_v49, %v2743_v23  ;;  %v143_v1 = vadd.f32 %v135_v41, %v94_v55  ;;  %v2777_v4 = vadd.f32 %v173_v53, %v146_v56  ;;  %v504_v29 = vmul.f32 %v503_v9, %v2725_v2 }
  0xa5   :  { %v2774_v62 = vadd.f32 1.0, %v515_v54  ;;  %v461_v5 = vadd.f32 0.05243302, %v460_v58  ;;  %v417_v7 = vadd.f32 0.00028619796, %v416_v60  ;;  %v145_v45 = vadd.f32 %v137_v30, %v96_v19 }
  0xa6   :  { %v472_v6 = vadd.f32 0.112945676, %v471_v59  ;;  %v428_v15 = vadd.f32 0.001143296, %v427_v0  ;;  %v2783_v16 = vadd.f32 %v158_v12, %v143_v1  ;;  %v2786_v17 = vmul.f32 0.70710677, %v2777_v4 }
  0xa7   :  { %2453 = vrcp.f32 %v2774_v62  ;;  %v418_v11 = vmul.f32 %v417_v7, %v2765_v50  ;;  %v462_v13 = vmul.f32 %v461_v5, %v2743_v23  ;;  %v526_v2 = vand.u32 2147483647, %v2774_v62 }
  0xa8   :  { %v473_v10 = vmul.f32 %v472_v6, %v2743_v23  ;;  %v429_v26 = vmul.f32 %v428_v15, %v2765_v50  ;;  %v2797_v28 = vmul.f32 0.70710677, %v2783_v16  ;;  %v374_v61 = vmul.f32 %v2786_v17, %v2786_v17 }
  0xa9   :  { %v103_v18 = vpop.permute.xlu0 %102  ;;  %v419_v25 = vadd.f32 0.0036580483, %v418_v11  ;;  %v463_v33 = vadd.f32 0.18741608, %v462_v13  ;;  %v528_v38 = vand.u32 2147483648, %v2774_v62  ;;  %vm522_vm0 = vweird.f32 %v2774_v62 }
  0xaa   :  { %v474_v21 = vadd.f32 0.4994258, %v473_v10  ;;  %v134_v22 = vmul.f32 %v2707_v51, %v103_v18  ;;  %v430_v34 = vadd.f32 0.014752088, %v429_v26  ;;  %v254_v52 = vmul.f32 %v2797_v28, %v2797_v28  ;;  %v168_v15 = vpop.permute.xlu1 %167 }
  0xab   :  { %v420_v3 = vmul.f32 %v419_v25, %v2765_v50  ;;  %v2818_v42 = vmin.f32 %v374_v61, 16.0  ;;  %v505_v43 = vadd.f32 1.1283791, %v504_v29  ;;  %v464_v46 = vmul.f32 %v463_v33, %v2743_v23 }
  0xac   :  { %v475_v47 = vmul.f32 %v474_v21, %v2743_v23  ;;  %v2807_v35 = vadd.f32 %v134_v22, %v93_v24  ;;  %v431_v39 = vmul.f32 %v430_v34, %v2765_v50  ;;  %v2816_v40 = vmin.f32 %v254_v52, 16.0 }
  0xad   :  { %v2454_v32 = vpop.eup %2453  ;;  %v376_v54 = vmul.f32 2.1237322e-06, %v2818_v42  ;;  %vm2826_vm2 = vcmp.eq.f32.partialorder %v526_v2, 8.507059e+37  ;;  %v529_v56 = vor.u32 1.1754944e-38, %v528_v38  ;;  %v421_v57 = vadd.f32 0.05243302, %v420_v3 }
  0xae   :  { %v518_v37 = vmul.f32 %v2454_v32, %v2774_v62  ;;  %v2812_v51 = vadd.f32 1.0, %v475_v47  ;;  %vm523_vm1 = vweird.f32 %v2454_v32  ;;  %v432_v48 = vadd.f32 0.112945676, %v431_v39 }
  0xaf   :  { %v256_v41 = vmul.f32 2.1237322e-06, %v2816_v40  ;;  %v267_v53 = vmul.f32 3.8918573e-05, %v2816_v40  ;;  %v377_v23 = vadd.f32 0.00028619796, %v376_v54  ;;  %v506_v1 = vmul.f32 %v505_v43, %v2720_v63  ;;  %vm524_vm3 = vmor %vm522_vm0, %vm523_vm1 }
  0xb0   :  { %v519_v44 = vsub.f32 1.0, %v518_v37  ;;  %2455 = vrcp.f32 %v2812_v51  ;;  %v433_v58 = vmul.f32 %v432_v48, %v2765_v50  ;;  %v465_v5 = vadd.f32 1.1283791, %v464_v46 }
  0xb1   :  { %v257_v60 = vadd.f32 0.00028619796, %v256_v41  ;;  %v268_v0 = vadd.f32 0.001143296, %v267_v53  ;;  %v387_v7 = vmul.f32 3.8918573e-05, %v2818_v42  ;;  %v378_v13 = vmul.f32 %v377_v23, %v2818_v42 }
  0xb2   :  { %v520_v49 = vmul.f32 %v2454_v32, %v519_v44  ;;  %v434_v6 = vadd.f32 0.4994258, %v433_v58  ;;  %v486_v62 = vand.u32 2147483647, %v2812_v51  ;;  %v422_v19 = vmul.f32 %v421_v57, %v2765_v50 }
  0xb3   :  { %v258_v11 = vmul.f32 %v257_v60, %v2816_v40  ;;  %v269_v12 = vmul.f32 %v268_v0, %v2816_v40  ;;  %v379_v29 = vadd.f32 0.0036580483, %v378_v13  ;;  %v388_v30 = vadd.f32 0.001143296, %v387_v7 }
  0xb4   :  { %v521_v59 = vadd.f32 %v2454_v32, %v520_v49  ;;  %v435_v22 = vmul.f32 %v434_v6, %v2765_v50  ;;  %v2845_v47 = vadd.f32 %v168_v15, %v145_v45  ;;  %vm482_vm5 = vweird.f32 %v2812_v51 }
  0xb5   :  { %v259_v24 = vadd.f32 0.0036580483, %v258_v11  ;;  %v270_v25 = vadd.f32 0.014752088, %v269_v12  ;;  %v380_v37 = vmul.f32 %v379_v29, %v2818_v42  ;;  %v389_v2 = vmul.f32 %v388_v30, %v2818_v42 }
  0xb6   :  { %v2456_v9 = vpop.eup %2455  ;;  %v525_v10 = vsel %vm524_vm3, %v2454_v32, %v521_v59  ;;  %v488_v32 = vand.u32 2147483648, %v2812_v51  ;;  %v2848_v33 = vadd.f32 1.0, %v435_v22  ;;  %v423_v3 = vadd.f32 0.18741608, %v422_v19 }
  0xb7   :  { %v530_v63 = vsel %vm2826_vm2, %v529_v56, %v525_v10  ;;  %v478_v18 = vmul.f32 %v2456_v9, %v2812_v51  ;;  %v271_v34 = vmul.f32 %v270_v25, %v2816_v40  ;;  %vm483_vm4 = vweird.f32 %v2456_v9 }
  0xb8   :  { %v531_v21 = vmul.f32 %v530_v63, %v506_v1  ;;  %2457 = vrcp.f32 %v2848_v33  ;;  %v260_v43 = vmul.f32 %v259_v24, %v2816_v40  ;;  %v2857_v45 = vmul.f32 0.70710677, %v2845_v47  ;;  %vm484_vm6 = vmor %vm482_vm5, %vm483_vm4  ;;  %v153_v24 = vpop.permute.xlu0 %152 }
  0xb9   :  { %v479_v26 = vsub.f32 1.0, %v478_v18  ;;  %v272_v44 = vadd.f32 0.112945676, %v271_v34  ;;  %v489_v48 = vor.u32 1.1754944e-38, %v488_v32  ;;  %v381_v49 = vadd.f32 0.05243302, %v380_v37 }
  0xba   :  { %v2424_v61 = vclamps-f32 %v531_v21, 1.0  ;;  %v390_v41 = vadd.f32 0.014752088, %v389_v2  ;;  %v466_v53 = vmul.f32 %v465_v5, %v2736_v14  ;;  %vm487_vm7 = vcmp.eq.f32.partialorder %v486_v62, 8.507059e+37 }
  0xbb   :  { %v480_v52 = vmul.f32 %v2456_v9, %v479_v26  ;;  %v273_v54 = vmul.f32 %v272_v44, %v2816_v40  ;;  %v424_v57 = vmul.f32 %v423_v3, %v2765_v50  ;;  %v261_v59 = vadd.f32 0.05243302, %v260_v43 }
  0xbc   :  { %v541_v38 = vadd.f32 1.0, %v2424_v61  ;;  %v391_v58 = vmul.f32 %v390_v41, %v2818_v42  ;;  %v334_v0 = vmul.f32 %v2857_v45, %v2857_v45  ;;  %v382_v14 = vmul.f32 %v381_v49, %v2818_v42 }
  0xbd   :  { %v481_v39 = vadd.f32 %v2456_v9, %v480_v52  ;;  %v274_v60 = vadd.f32 0.4994258, %v273_v54  ;;  %v204_v5 = vmul.f32 0.5, %v2731_v8  ;;  %v446_v7 = vand.u32 2147483647, %v2848_v33 }
  0xbe   :  { %v2860_v46 = vmul.f32 %v541_v38, %v2791_v20  ;;  %v2458_v23 = vpop.eup %2457  ;;  %v392_v1 = vadd.f32 0.112945676, %v391_v58  ;;  %v448_v10 = vand.u32 2147483648, %v2848_v33  ;;  %v2880_v13 = vmin.f32 %v334_v0, 16.0 }
  0xbf   :  { %v485_v51 = vsel %vm484_vm6, %v2456_v9, %v481_v39  ;;  %v438_v50 = vmul.f32 %v2458_v23, %v2848_v33  ;;  %v163_v9 = vpop.permute.xlu1 %162  ;;  %v275_v11 = vmul.f32 %v274_v60, %v2816_v40  ;;  %v425_v63 = vadd.f32 1.1283791, %v424_v57 }
  0xc0   :  { %v2865_v55 = vand.u32 4294901760, %v2860_v46  ;;  %v490_v56 = vsel %vm487_vm7, %v489_v48, %v485_v51  ;;  %v393_v12 = vmul.f32 %v392_v1, %v2818_v42  ;;  %v262_v62 = vmul.f32 %v261_v59, %v2816_v40 }
  0xc1   :  { %v491_v20 = vmul.f32 %v490_v56, %v466_v53  ;;  %v439_v18 = vsub.f32 1.0, %v438_v50  ;;  %v2883_v8 = vadd.f32 1.0, %v275_v11  ;;  %v383_v19 = vadd.f32 0.18741608, %v382_v14 }
  0xc2   :  { %640 = vmatpush.msra.mxu0 %v2865_v55  ;;  %891 = vmatpush.msra.mxu3 %v2865_v55  ;;  %v394_v21 = vadd.f32 0.4994258, %v393_v12  ;;  %v2886_v22 = vadd.f32 %v163_v9, %v2752_v31  ;;  %vm443_vm8 = vweird.f32 %v2458_v23  ;;  %v336_v29 = vmul.f32 2.1237322e-06, %v2880_v13 }
  0xc3   :  { %v2423_v6 = vclamps-f32 %v491_v20, 1.0  ;;  %v440_v26 = vmul.f32 %v2458_v23, %v439_v18  ;;  %vm442_vm9 = vweird.f32 %v2848_v33  ;;  %vm2892_vm10 = vcmp.eq.f32.partialorder %v446_v7, 8.507059e+37 }
  0xc4   :  { %v449_v61 = vor.u32 1.1754944e-38, %v448_v10  ;;  %2459 = vrcp.f32 %v2883_v8  ;;  %v395_v34 = vmul.f32 %v394_v21, %v2818_v42  ;;  %v2902_v52 = vadd.f32 %v153_v24, %v2807_v35  ;;  %vm444_vm11 = vmor %vm442_vm9, %vm443_vm8 }
  0xc5   :  { %v540_v15 = vadd.f32 1.0, %v2423_v6  ;;  %v441_v31 = vadd.f32 %v2458_v23, %v440_v26  ;;  %v426_v37 = vmul.f32 %v425_v63, %v2755_v36  ;;  %v263_v33 = vadd.f32 0.18741608, %v262_v62 }
  0xc6   :  { %v337_v2 = vadd.f32 0.00028619796, %v336_v29  ;;  %v347_v38 = vmul.f32 3.8918573e-05, %v2880_v13  ;;  %v384_v39 = vmul.f32 %v383_v19, %v2818_v42  ;;  %v2907_v43 = vadd.f32 1.0, %v395_v34 }
  0xc7   :  { %v2888_v25 = vmul.f32 %v540_v15, %v204_v5  ;;  %v445_v3 = vsel %vm444_vm11, %v2458_v23, %v441_v31  ;;  %v2910_v44 = vmul.f32 0.70710677, %v2886_v22  ;;  %v2919_v49 = vsub.f32 %v2860_v46, %v2865_v55 }
  0xc8   :  { %v450_v36 = vsel %vm2892_vm10, %v449_v61, %v445_v3  ;;  %v338_v35 = vmul.f32 %v337_v2, %v2880_v13  ;;  %v348_v48 = vadd.f32 0.001143296, %v347_v38  ;;  %2461 = vrcp.f32 %v2907_v43 }
  0xc9   :  { %v2898_v32 = vand.u32 4294901760, %v2888_v25  ;;  %v451_v42 = vmul.f32 %v450_v36, %v426_v37  ;;  %v2923_v41 = vmul.f32 0.70710677, %v2902_v52  ;;  %v294_v54 = vmul.f32 %v2910_v44, %v2910_v44  ;;  %819 = vmatpush.msra.mxu2 %v2919_v49 }
  0xca   :  { %v2925_v53 = vpop.eup %2459  ;;  %v349_v51 = vmul.f32 %v348_v48, %v2880_v13  ;;  %v385_v57 = vadd.f32 1.1283791, %v384_v39  ;;  %v339_v58 = vadd.f32 0.0036580483, %v338_v35  ;;  %v203_v20 = vmul.f32 0.5, %v2747_v27 }
  0xcb   :  { %642 = vmatpush.msra.mxu0 %v2898_v32  ;;  %893 = vmatpush.msra.mxu3 %v2898_v32  ;;  %v2422_v56 = vclamps-f32 %v451_v42, 1.0  ;;  %v278_v46 = vmul.f32 %v2925_v53, %v2883_v8  ;;  %v2935_v59 = vmul.f32 %v263_v33, %v2816_v40  ;;  %v2937_v0 = vmin.f32 %v294_v54, 16.0 }
  0xcc   :  { %v350_v60 = vadd.f32 0.014752088, %v349_v51  ;;  %v286_v1 = vand.u32 2147483647, %v2883_v8  ;;  %v214_v5 = vmul.f32 %v2923_v41, %v2923_v41  ;;  %v288_v6 = vand.u32 2147483648, %v2883_v8 }
  0xcd   :  { %v539_v23 = vadd.f32 1.0, %v2422_v56  ;;  %v279_v14 = vsub.f32 1.0, %v278_v46  ;;  %v296_v7 = vmul.f32 2.1237322e-06, %v2937_v0  ;;  %v307_v27 = vmul.f32 3.8918573e-05, %v2937_v0 }
  0xce   :  { %v351_v50 = vmul.f32 %v350_v60, %v2880_v13  ;;  %v2462_v40 = vpop.eup %2461  ;;  %v386_v10 = vmul.f32 %v385_v57, %v2786_v17  ;;  %v340_v11 = vmul.f32 %v339_v58, %v2880_v13  ;;  %v2950_v12 = vmin.f32 %v214_v5, 16.0 }
  0xcf   :  { %v2946_v9 = vmul.f32 %v539_v23, %v203_v20  ;;  %vm282_vm12 = vweird.f32 %v2883_v8  ;;  %v398_v15 = vmul.f32 %v2462_v40, %v2907_v43  ;;  %vm402_vm13 = vweird.f32 %v2907_v43 }
  0xd0   :  { %v406_v63 = vand.u32 2147483647, %v2907_v43  ;;  %v352_v18 = vadd.f32 0.112945676, %v351_v50  ;;  %v280_v19 = vmul.f32 %v2925_v53, %v279_v14  ;;  %v297_v21 = vadd.f32 0.00028619796, %v296_v7 }
  0xd1   :  { %v2957_v62 = vand.u32 4294901760, %v2946_v9  ;;  %v308_v17 = vadd.f32 0.001143296, %v307_v27  ;;  %v399_v24 = vsub.f32 1.0, %v398_v15  ;;  %v408_v26 = vand.u32 2147483648, %v2907_v43 }
  0xd2   :  { %v353_v29 = vmul.f32 %v352_v18, %v2880_v13  ;;  %v216_v30 = vmul.f32 2.1237322e-06, %v2950_v12  ;;  %v341_v61 = vadd.f32 0.05243302, %v340_v11  ;;  %v298_v31 = vmul.f32 %v297_v21, %v2937_v0 }
  0xd3   :  { %v309_v34 = vmul.f32 %v308_v17, %v2937_v0  ;;  %v227_v37 = vmul.f32 3.8918573e-05, %v2950_v12  ;;  %644 = vmatpush.msra.mxu0 %v2957_v62  ;;  %895 = vmatpush.msra.mxu3 %v2957_v62  ;;  %vm283_vm14 = vweird.f32 %v2925_v53  ;;  %v400_v33 = vmul.f32 %v2462_v40, %v399_v24 }
  0xd4   :  { %vm403_vm15 = vweird.f32 %v2462_v40  ;;  %v354_v2 = vadd.f32 0.4994258, %v353_v29  ;;  %v281_v38 = vadd.f32 %v2925_v53, %v280_v19  ;;  %v217_v39 = vadd.f32 0.00028619796, %v216_v30  ;;  %vm2984_vm2 = vmor %vm282_vm12, %vm283_vm14 }
  0xd5   :  { %v310_v3 = vadd.f32 0.014752088, %v309_v34  ;;  %v730_v36 = vand.u32 4294901760, %v2919_v49  ;;  %v401_v35 = vadd.f32 %v2462_v40, %v400_v33  ;;  %v299_v42 = vadd.f32 0.0036580483, %v298_v31  ;;  %vm404_vm0 = vmor %vm402_vm13, %vm403_vm15 }
  0xd6   :  { %v355_v48 = vmul.f32 %v354_v2, %v2880_v13  ;;  %v228_v51 = vadd.f32 0.001143296, %v227_v37  ;;  %vm407_vm1 = vcmp.eq.f32.partialorder %v406_v63, 8.507059e+37  ;;  %v409_v54 = vor.u32 1.1754944e-38, %v408_v26 }
  0xd7   :  { %v342_v56 = vmul.f32 %v341_v61, %v2880_v13  ;;  %v311_v46 = vmul.f32 %v310_v3, %v2937_v0  ;;  %v405_v57 = vsel %vm404_vm0, %v2462_v40, %v401_v35  ;;  %v218_v20 = vmul.f32 %v217_v39, %v2950_v12 }
  0xd8   :  { %v2976_v58 = vadd.f32 1.0, %v355_v48  ;;  %v229_v60 = vmul.f32 %v228_v51, %v2950_v12  ;;  %v410_v23 = vsel %vm407_vm1, %v409_v54, %v405_v57  ;;  %v731_v5 = vsub.f32 %v2919_v49, %v730_v36 }
  0xd9   :  { %v312_v14 = vadd.f32 0.112945676, %v311_v46  ;;  %v285_v50 = vsel %vm2984_vm2, %v2925_v53, %v281_v38  ;;  %v411_v7 = vmul.f32 %v410_v23, %v386_v10  ;;  %v300_v27 = vmul.f32 %v299_v42, %v2937_v0 }
  0xda   :  { %2463 = vrcp.f32 %v2976_v58  ;;  %v265_v40 = vadd.f32 1.1283791, %v2935_v59  ;;  %v289_v11 = vor.u32 1.1754944e-38, %v288_v6  ;;  %v343_v15 = vadd.f32 0.18741608, %v342_v56 }
  0xdb   :  { %v313_v63 = vmul.f32 %v312_v14, %v2937_v0  ;;  %vm287_vm3 = vcmp.eq.f32.partialorder %v286_v1, 8.507059e+37  ;;  %v2421_v18 = vclamps-f32 %v411_v7, 1.0  ;;  %v219_v19 = vadd.f32 0.0036580483, %v218_v20 }
  0xdc   :  { %v230_v21 = vadd.f32 0.014752088, %v229_v60  ;;  %v290_v17 = vsel %vm287_vm3, %v289_v11, %v285_v50  ;;  %v202_v53 = vmul.f32 0.5, %v2777_v4  ;;  %v732_v24 = vand.u32 4294901760, %v731_v5 }
  0xdd   :  { %v314_v10 = vadd.f32 0.4994258, %v313_v63  ;;  %v538_v26 = vadd.f32 1.0, %v2421_v18  ;;  %v301_v29 = vadd.f32 0.05243302, %v300_v27  ;;  %v3004_v59 = vsub.f32 %v2888_v25, %v2898_v32 }
  0xde   :  { %v231_v30 = vmul.f32 %v230_v21, %v2950_v12  ;;  %v266_v6 = vmul.f32 %v265_v40, %v2797_v28  ;;  %v344_v8 = vmul.f32 %v343_v15, %v2880_v13  ;;  %733 = vmatpush.msra.mxu1 %v732_v24  ;;  %v3011_v4 = vsub.f32 %v2946_v9, %v2957_v62 }
  0xdf   :  { %v315_v1 = vmul.f32 %v314_v10, %v2937_v0  ;;  %v546_v31 = vmul.f32 %v538_v26, %v202_v53  ;;  %v220_v34 = vmul.f32 %v219_v19, %v2950_v12  ;;  %822 = vmatpush.msra.mxu2 %v3004_v59  ;;  %v736_v25 = vand.u32 4294901760, %v3004_v59 }
  0xe0   :  { %v2464_v61 = vpop.eup %2463  ;;  %v232_v37 = vadd.f32 0.112945676, %v231_v30  ;;  %v291_v33 = vmul.f32 %v290_v17, %v266_v6  ;;  %v302_v38 = vmul.f32 %v301_v29, %v2937_v0  ;;  %v345_v39 = vadd.f32 1.1283791, %v344_v8  ;;  %v550_v6 = vld [vmem:[%s4009_s3] sm:$0xff] }
  0xe1   :  { %v358_v28 = vmul.f32 %v2464_v61, %v2976_v58  ;;  %v3017_v13 = vadd.f32 1.0, %v315_v1  ;;  %v3019_v2 = vand.u32 4294901760, %v546_v31  ;;  %v737_v3 = vsub.f32 %v3004_v59, %v736_v25  ;;  %825 = vmatpush.msra.mxu2 %v3011_v4 }
  0xe2   :  { %v233_v9 = vmul.f32 %v232_v37, %v2950_v12  ;;  %v366_v48 = vand.u32 2147483647, %v2976_v58  ;;  %vm363_vm4 = vweird.f32 %v2464_v61  ;;  %v368_v42 = vand.u32 2147483648, %v2976_v58 }
  0xe3   :  { %v359_v35 = vsub.f32 1.0, %v358_v28  ;;  %2465 = vrcp.f32 %v3017_v13  ;;  %v221_v51 = vadd.f32 0.05243302, %v220_v34  ;;  %v738_v54 = vand.u32 4294901760, %v737_v3  ;;  %646 = vmatpush.msra.mxu0 %v3019_v2  ;;  %897 = vmatpush.msra.mxu3 %v3019_v2 }
  0xe4   :  { %v234_v46 = vadd.f32 0.4994258, %v233_v9  ;;  %v742_v57 = vand.u32 4294901760, %v3011_v4  ;;  %v3034_v20 = vsub.f32 %v546_v31, %v3019_v2  ;;  %v2418_v60 = vclamps-f32 %v291_v33, 1.0 }
  0xe5   :  { %v360_v56 = vmul.f32 %v2464_v61, %v359_v35  ;;  %vm362_vm5 = vweird.f32 %v2976_v58  ;;  %v303_v43 = vadd.f32 0.18741608, %v302_v38  ;;  %739 = vmatpush.msra.mxu1 %v738_v54  ;;  %v346_v7 = vmul.f32 %v345_v39, %v2857_v45 }
  0xe6   :  { %v235_v14 = vmul.f32 %v234_v46, %v2950_v12  ;;  %v743_v5 = vsub.f32 %v3011_v4, %v742_v57  ;;  %828 = vmatpush.msra.mxu2 %v3034_v20  ;;  %v748_v50 = vand.u32 4294901760, %v3034_v20  ;;  %vm364_vm6 = vmor %vm362_vm5, %vm363_vm4  ;;  %vm367_vm7 = vcmp.eq.f32.partialorder %v366_v48, 8.507059e+37 }
  0xe7   :  { %v361_v23 = vadd.f32 %v2464_v61, %v360_v56  ;;  %v369_v27 = vor.u32 1.1754944e-38, %v368_v42  ;;  %v222_v58 = vmul.f32 %v221_v51, %v2950_v12  ;;  %v304_v21 = vmul.f32 %v303_v43, %v2937_v0 }
  0xe8   :  { %v3046_v15 = vadd.f32 1.0, %v235_v14  ;;  %v744_v63 = vand.u32 4294901760, %v743_v5  ;;  %v749_v18 = vsub.f32 %v3034_v20, %v748_v50  ;;  %v535_v53 = vadd.f32 1.0, %v2418_v60  ;;  %v551_v60 = vld [vmem:[%s4009_s3 + $0x8] sm:$0xff] }
  0xe9   :  { %v2466_v40 = vpop.eup %2465  ;;  %v365_v11 = vsel %vm364_vm6, %v2464_v61, %v361_v23  ;;  %v328_v29 = vand.u32 2147483648, %v3017_v13  ;;  %v223_v30 = vadd.f32 0.18741608, %v222_v58  ;;  %vm606_vm8 = vcmask 523264  }
  0xea   :  { %v370_v19 = vsel %vm367_vm7, %v369_v27, %v365_v11  ;;  %v318_v45 = vmul.f32 %v2466_v40, %v3017_v13  ;;  %2467 = vrcp.f32 %v3046_v15  ;;  %745 = vmatpush.msra.mxu1 %v744_v63  ;;  %v750_v24 = vand.u32 4294901760, %v749_v18 }
  0xeb   :  { %v371_v17 = vmul.f32 %v370_v19, %v346_v7  ;;  %v305_v8 = vadd.f32 1.1283791, %v304_v21  ;;  %vm323_vm9 = vweird.f32 %v2466_v40  ;;  %v326_v1 = vand.u32 2147483647, %v3017_v13 }
  0xec   :  { %v319_v10 = vsub.f32 1.0, %v318_v45  ;;  %751 = vmatpush.msra.mxu1 %v750_v24  ;;  %v199_v61 = vmul.f32 0.5, %v2783_v16  ;;  %v201_v31 = vmul.f32 0.5, %v2845_v47  ;;  %vm322_vm10 = vweird.f32 %v3017_v13 }
  0xed   :  { %v2420_v26 = vclamps-f32 %v371_v17, 1.0  ;;  %v608_v33 = vsel %vm606_vm8, %v550_v6, 0  ;;  %vm324_vm11 = vmor %vm322_vm10, %vm323_vm9  ;;  %v329_v3 = vor.u32 1.1754944e-38, %v328_v29  ;;  %v224_v39 = vmul.f32 %v223_v30, %v2950_v12  ;;  %v552_v29 = vld [vmem:[%s4009_s3 + $0x10] sm:$0xff] }
  0xee   :  { %v320_v0 = vmul.f32 %v2466_v40, %v319_v10  ;;  %v543_v38 = vmul.f32 %v535_v53, %v199_v61  ;;  %v306_v35 = vmul.f32 %v305_v8, %v2910_v44  ;;  %vm327_vm12 = vcmp.eq.f32.partialorder %v326_v1, 8.507059e+37 }
  0xef   :  { %v537_v34 = vadd.f32 1.0, %v2420_v26  ;;  %v3068_v51 = vand.u32 4294901760, %v608_v33  ;;  %v225_v56 = vadd.f32 1.1283791, %v224_v39  ;;  %v248_v46 = vand.u32 2147483648, %v3046_v15 }
  0xf0   :  { %v321_v37 = vadd.f32 %v2466_v40, %v320_v0  ;;  %v2468_v28 = vpop.eup %2467  ;;  %v3076_v12 = vand.u32 4294901760, %v543_v38  ;;  %v246_v14 = vand.u32 2147483647, %v3046_v15  ;;  %v200_v5 = vmul.f32 0.5, %v2886_v22 }
  0xf1   :  { %v545_v9 = vmul.f32 %v537_v34, %v201_v31  ;;  %v238_v16 = vmul.f32 %v2468_v28, %v3046_v15  ;;  %vm243_vm13 = vweird.f32 %v2468_v28  ;;  %v656_v27 = vsub.f32 %v608_v33, %v3068_v51 }
  0xf2   :  { %v325_v48 = vsel %vm324_vm11, %v2466_v40, %v321_v37  ;;  %vm242_vm14 = vweird.f32 %v3046_v15  ;;  %v611_v11 = vsel %vm606_vm8, %v551_v60, 0  ;;  %v249_v63 = vor.u32 1.1754944e-38, %v248_v46 }
  0xf3   :  { %v3066_v47 = vand.u32 4294901760, %v545_v9  ;;  %v330_v42 = vsel %vm327_vm12, %v329_v3, %v325_v48  ;;  %v239_v54 = vsub.f32 1.0, %v238_v16  ;;  %vm244_vm15 = vmor %vm242_vm14, %vm243_vm13  ;;  %v3092_v22 = vsub.f32 %v543_v38, %v3076_v12 }
  0xf4   :  { %v331_v13 = vmul.f32 %v330_v42, %v306_v35  ;;  %v226_v21 = vmul.f32 %v225_v56, %v2923_v41  ;;  %vm247_vm0 = vcmp.eq.f32.partialorder %v246_v14, 8.507059e+37  ;;  %v657_v10 = vand.u32 4294901760, %v656_v27  ;;  %v553_v35 = vld [vmem:[%s4009_s3 + $0x18] sm:$0xff] }
  0xf5   :  { %648 = vmatpush.msra.mxu0 %v3066_v47  ;;  %899 = vmatpush.msra.mxu3 %v3066_v47  ;;  %v3074_v44 = vsub.f32 %v545_v9, %v3066_v47  ;;  %v240_v23 = vmul.f32 %v2468_v28, %v239_v54  ;;  %v3095_v15 = vand.u32 4294901760, %v611_v11  ;;  %v766_v8 = vand.u32 4294901760, %v3092_v22 }
  0xf6   :  { %v2419_v43 = vclamps-f32 %v331_v13, 1.0  ;;  %v658_v6 = vsub.f32 %v656_v27, %v657_v10  ;;  %v198_v1 = vmul.f32 0.5, %v2902_v52  ;;  %v614_v34 = vsel %vm606_vm8, %v552_v29, 0 }
  0xf7   :  { %831 = vmatpush.msra.mxu2 %v3074_v44  ;;  %v754_v7 = vand.u32 4294901760, %v3074_v44  ;;  %v241_v40 = vadd.f32 %v2468_v28, %v240_v23  ;;  %v664_v0 = vsub.f32 %v611_v11, %v3095_v15  ;;  %v767_v38 = vsub.f32 %v3092_v22, %v766_v8 }
  0xf8   :  { %v536_v58 = vadd.f32 1.0, %v2419_v43  ;;  %v3113_v3 = vand.u32 4294901760, %v614_v34  ;;  %v617_v56 = vsel %vm606_vm8, %v553_v35, 0 }
  0xf9   :  { %v755_v18 = vsub.f32 %v3074_v44, %v754_v7  ;;  %v245_v45 = vsel %vm244_vm15, %v2468_v28, %v241_v40  ;;  %v659_v28 = vand.u32 4294901760, %v658_v6  ;;  %v665_v9 = vand.u32 4294901760, %v664_v0  ;;  %v555_v44 = vld [vmem:[%s4009_s3 + $0x28] sm:$0xff] }
  0xfa   :  { %v544_v19 = vmul.f32 %v536_v58, %v200_v5  ;;  %v250_v17 = vsel %vm247_vm0, %v249_v63, %v245_v45  ;;  %v768_v16 = vand.u32 4294901760, %v767_v38  ;;  %v672_v13 = vsub.f32 %v614_v34, %v3113_v3 }
  0xfb   :  { %v756_v53 = vand.u32 4294901760, %v755_v18  ;;  %v251_v26 = vmul.f32 %v250_v17, %v226_v21  ;;  %v666_v42 = vsub.f32 %v664_v0, %v665_v9  ;;  %v3124_v23 = vand.u32 4294901760, %v617_v56 }
  0xfc   :  { %v3097_v24 = vand.u32 4294901760, %v544_v19  ;;  %v673_v43 = vand.u32 4294901760, %v672_v13  ;;  %v623_v14 = vsel %vm606_vm8, %v555_v44, 0 }
  0xfd   :  { %757 = vmatpush.msra.mxu1 %v756_v53  ;;  %v2417_v30 = vclamps-f32 %v251_v26, 1.0  ;;  %v667_v60 = vand.u32 4294901760, %v666_v42 }
  0xfe   :  { %650 = vmatpush.msra.mxu0 %v3097_v24  ;;  %901 = vmatpush.msra.mxu3 %v3097_v24  ;;  %v759_v41 = vsub.f32 %v544_v19, %v3097_v24  ;;  %v674_v59 = vsub.f32 %v672_v13, %v673_v43 }
  0xff   :  { %v534_v61 = vadd.f32 1.0, %v2417_v30 }
 0x100   :  { %652 = vmatpush.msra.mxu0 %v3076_v12  ;;  %834 = vmatpush.msra.mxu2 %v759_v41  ;;  %v760_v31 = vand.u32 4294901760, %v759_v41 }
 0x101   :  { %903 = vmatpush.msra.mxu3 %v3076_v12  ;;  %v542_v37 = vmul.f32 %v534_v61, %v198_v1 }
 0x102   :  { %837 = vmatpush.msra.mxu2 %v3092_v22  ;;  %v761_v33 = vsub.f32 %v759_v41, %v760_v31  ;;  %v599_v41 = vpop.permute.xlu2 %598 }
 0x103   :  { %v653_v52 = vand.u32 4294901760, %v542_v37 }
 0x104   :  { %v762_v39 = vand.u32 4294901760, %v761_v33 }
 0x105   :  { %654 = vmatpush.msra.mxu0 %v653_v52  ;;  %905 = vmatpush.msra.mxu3 %v653_v52  ;;  %v771_v48 = vsub.f32 %v542_v37, %v653_v52 }
 0x106   :  { %660 = vmatmul.f32.vlgmr.msra.gmra.mxu0 %v659_v28  ;;  %763 = vmatpush.msra.mxu1 %v762_v39 }
 0x107   :  { %966 = vmatpush.msrb.mxu0 %v730_v36  ;;  %840 = vmatpush.msra.mxu2 %v771_v48  ;;  %v772_v54 = vand.u32 4294901760, %v771_v48  ;;  %v554_v36 = vld [vmem:[%s4009_s3 + $0x20] sm:$0xff] }
 0x108   :  { %843 = vmatmul.f32.vlgmr.msra.gmra.mxu2 %v656_v27  ;;  %769 = vmatpush.msra.mxu1 %v768_v16  ;;  %v620_v4 = vsel %vm606_vm8, %v554_v36, 0 }
 0x109   :  { %970 = vmatpush.msrb.mxu0 %v736_v25  ;;  %909 = vmatmul.f32.vlgmr.msra.gmra.mxu3 %v657_v10  ;;  %v773_v46 = vsub.f32 %v771_v48, %v772_v54  ;;  %v680_v25 = vsub.f32 %v617_v56, %v3124_v23 }
 0x10b   :  { %974 = vmatpush.msrb.mxu0 %v742_v57  ;;  %v774_v49 = vand.u32 4294901760, %v773_v46  ;;  %v675_v57 = vand.u32 4294901760, %v674_v59  ;;  %v681_v20 = vand.u32 4294901760, %v680_v25 }
 0x10d   :  { %978 = vmatpush.msrb.mxu0 %v748_v50  ;;  %775 = vmatpush.msra.mxu1 %v774_v49  ;;  %v3140_v50 = vand.u32 4294901760, %v620_v4 }
 0x10e   :  { %668 = vmatmul.f32.gmra.mxu0 %v667_v60  ;;  %777 = vmatmul.f32.vlgmr.msra.gmra.mxu1 %v3068_v51 }
 0x10f   :  { %982 = vmatpush.msrb.mxu0 %v754_v7  ;;  %1037 = vmatpush.msrb.mxu1 %v2865_v55  ;;  %v682_v55 = vsub.f32 %v680_v25, %v681_v20  ;;  %v695_v7 = vand.u32 4294901760, %v623_v14 }
 0x110   :  { %848 = vmatmul.f32.gmra.mxu2 %v664_v0 }
 0x111   :  { %986 = vmatpush.msrb.mxu0 %v760_v31  ;;  %1039 = vmatpush.msrb.mxu1 %v2898_v32  ;;  %v688_v32 = vsub.f32 %v620_v4, %v3140_v50  ;;  %v696_v27 = vsub.f32 %v623_v14, %v695_v7 }
 0x112   :  { %915 = vmatmul.f32.gmra.mxu3 %v665_v9 }
 0x113   :  { %990 = vmatpush.msrb.mxu0 %v766_v8  ;;  %1041 = vmatpush.msrb.mxu1 %v2957_v62  ;;  %v683_v62 = vand.u32 4294901760, %v682_v55  ;;  %v689_v5 = vand.u32 4294901760, %v688_v32  ;;  %v697_v11 = vand.u32 4294901760, %v696_v27  ;;  %v3174_v8 = vpop.permute.xlu1 %603 }
 0x115   :  { %994 = vmatpush.msrb.mxu0 %v772_v54  ;;  %1043 = vmatpush.msrb.mxu1 %v3019_v2  ;;  %v556_v2 = vld [vmem:[%s4009_s3 + $0x30] sm:$0xff]  ;;  %v698_v18 = vsub.f32 %v696_v27, %v697_v11 }
 0x116   :  { %676 = vmatmul.f32.gmra.mxu0 %v675_v57  ;;  %781 = vmatmul.f32.gmra.mxu1 %v3095_v15  ;;  %v626_v58 = vsel %vm606_vm8, %v556_v2, 0 }
 0x117   :  { %1045 = vmatpush.msrb.mxu1 %v3066_v47  ;;  %v690_v47 = vsub.f32 %v688_v32, %v689_v5  ;;  %v703_v63 = vand.u32 4294901760, %v626_v58  ;;  %v699_v21 = vand.u32 4294901760, %v698_v18 }
 0x118   :  { %853 = vmatmul.f32.gmra.mxu2 %v672_v13 }
 0x119   :  { %1047 = vmatpush.msrb.mxu1 %v3097_v24  ;;  %v691_v40 = vand.u32 4294901760, %v690_v47  ;;  %v704_v22 = vsub.f32 %v626_v58, %v703_v63 }
 0x11a   :  { %921 = vmatmul.f32.gmra.mxu3 %v673_v43 }
 0x11b   :  { %1049 = vmatpush.msrb.mxu1 %v3076_v12  ;;  %v557_v12 = vld [vmem:[%s4009_s3 + $0x38] sm:$0xff]  ;;  %v705_v45 = vand.u32 4294901760, %v704_v22  ;;  %v594_v38 = vpop.permute.xlu1 %593 }
 0x11c   :  { %v629_v19 = vsel %vm606_vm8, %v557_v12, 0 }
 0x11d   :  { %1051 = vmatpush.msrb.mxu1 %v653_v52  ;;  %v711_v17 = vand.u32 4294901760, %v629_v19  ;;  %v706_v53 = vsub.f32 %v704_v22, %v705_v45 }
 0x11e   :  { %684 = vmatmul.f32.gmra.mxu0 %v683_v62  ;;  %785 = vmatmul.f32.gmra.mxu1 %v3113_v3 }
 0x11f   :  { %v712_v10 = vsub.f32 %v629_v19, %v711_v17  ;;  %v707_v24 = vand.u32 4294901760, %v706_v53 }
 0x120   :  { %858 = vmatmul.f32.gmra.mxu2 %v680_v25 }
 0x121   :  { %v713_v26 = vand.u32 4294901760, %v712_v10 }
 0x122   :  { %927 = vmatmul.f32.gmra.mxu3 %v681_v20 }
 0x123   :  { %v714_v29 = vsub.f32 %v712_v10, %v713_v26  ;;  %v579_v16 = vpop.permute.xlu1 %578 }
 0x125   :  { %v715_v30 = vand.u32 4294901760, %v714_v29 }
 0x126   :  { %692 = vmatmul.f32.gmra.mxu0 %v691_v40  ;;  %789 = vmatmul.f32.gmra.mxu1 %v3124_v23 }
 0x128   :  { %863 = vmatmul.f32.gmra.mxu2 %v688_v32 }
 0x12a   :  { %933 = vmatmul.f32.gmra.mxu3 %v689_v5 }
 0x12e   :  { %700 = vmatmul.f32.gmra.mxu0 %v699_v21  ;;  %793 = vmatmul.f32.gmra.mxu1 %v3140_v50 }
 0x130   :  { %868 = vmatmul.f32.gmra.mxu2 %v696_v27 }
 0x132   :  { %939 = vmatmul.f32.gmra.mxu3 %v697_v11 }
 0x136   :  { %708 = vmatmul.f32.gmra.mxu0 %v707_v24  ;;  %797 = vmatmul.f32.gmra.mxu1 %v695_v7 }
 0x138   :  { %873 = vmatmul.f32.gmra.mxu2 %v704_v22 }
 0x13a   :  { %945 = vmatmul.f32.gmra.mxu3 %v705_v45 }
 0x13e   :  { %716 = vmatmul.f32.gmra.mxu0 %v715_v30  ;;  %801 = vmatmul.f32.gmra.mxu1 %v703_v63 }
 0x140   :  { %878 = vmatmul.f32.gmra.mxu2 %v712_v10 }
 0x142   :  { %951 = vmatmul.f32.gmra.mxu3 %v713_v26 }
 0x146   :  { %805 = vmatmul.f32.gmra.mxu1 %v711_v17  ;;  %996 = vmatmul.f32.vlgmr.msrb.gmra.mxu0 %v3068_v51 }
 0x14e   :  { %1000 = vmatmul.f32.gmra.mxu0 %v3095_v15  ;;  %1053 = vmatmul.f32.vlgmr.msrb.gmra.mxu1 %v3068_v51  ;;  %v584_v51 = vpop.permute.xlu0 %583 }
 0x156   :  { %1004 = vmatmul.f32.gmra.mxu0 %v3113_v3  ;;  %1057 = vmatmul.f32.gmra.mxu1 %v3095_v15  ;;  %v589_v15 = vpop.permute.xlu2 %588  ;;  %v569_v0 = vpop.permute.xlu0 %568 }
 0x15e   :  { %1008 = vmatmul.f32.gmra.mxu0 %v3124_v23  ;;  %1061 = vmatmul.f32.gmra.mxu1 %v3113_v3  ;;  %v574_v3 = vpop.permute.xlu2 %573 }
 0x166   :  { %1012 = vmatmul.f32.gmra.mxu0 %v3140_v50  ;;  %1065 = vmatmul.f32.gmra.mxu1 %v3124_v23 }
 0x16e   :  { %1016 = vmatmul.f32.gmra.mxu0 %v695_v7  ;;  %1069 = vmatmul.f32.gmra.mxu1 %v3140_v50 }
 0x176   :  { %1020 = vmatmul.f32.gmra.mxu0 %v703_v63  ;;  %1073 = vmatmul.f32.gmra.mxu1 %v695_v7 }
 0x17e   :  { %1024 = vmatmul.f32.gmra.mxu0 %v711_v17  ;;  %1077 = vmatmul.f32.gmra.mxu1 %v703_v63 }
 0x183   :  { %v661_v6 = vpop.f32.mrf.mxu0 }
 0x184   :  { %v662_v1 = vadd.f32 %v661_v6, %v569_v0 }
 0x186   :  { %1081 = vmatmul.f32.gmra.mxu1 %v711_v17 }
 0x18b   :  { %v669_v61 = vpop.f32.mrf.mxu0  ;;  %v778_v31 = vpop.f32.mrf.mxu1 }
 0x18c   :  { %v779_v34 = vadd.f32 %v778_v31, %v662_v1  ;;  %v844_v37 = vpop.f32.mrf.mxu2  ;;  %v910_v33 = vpop.f32.mrf.mxu3  ;;  %v670_v52 = vadd.f32 %v669_v61, %v574_v3 }
 0x18e   :  { %v845_v28 = vadd.f32 %v844_v37, %v779_v34 }
 0x190   :  { %v911_v9 = vadd.f32 %v910_v33, %v845_v28 }
 0x193   :  { %v677_v39 = vpop.f32.mrf.mxu0  ;;  %v782_v35 = vpop.f32.mrf.mxu1 }
 0x194   :  { %v783_v48 = vadd.f32 %v782_v35, %v670_v52  ;;  %v678_v42 = vadd.f32 %v677_v39, %v579_v16  ;;  %v849_v2 = vpop.f32.mrf.mxu2 }
 0x195   :  { %v916_v47 = vpop.f32.mrf.mxu3 }
 0x196   :  { %v850_v11 = vadd.f32 %v849_v2, %v783_v48 }
 0x198   :  { %v917_v12 = vadd.f32 %v916_v47, %v850_v11 }
 0x19b   :  { %v685_v13 = vpop.f32.mrf.mxu0  ;;  %v786_v54 = vpop.f32.mrf.mxu1 }
 0x19c   :  { %v787_v56 = vadd.f32 %v786_v54, %v678_v42  ;;  %v686_v46 = vadd.f32 %v685_v13, %v584_v51  ;;  %v854_v63 = vpop.f32.mrf.mxu2 }
 0x19d   :  { %v922_v18 = vpop.f32.mrf.mxu3 }
 0x19e   :  { %v855_v53 = vadd.f32 %v854_v63, %v787_v56 }
 0x1a0   :  { %v923_v29 = vadd.f32 %v922_v18, %v855_v53 }
 0x1a3   :  { %v693_v60 = vpop.f32.mrf.mxu0  ;;  %v790_v43 = vpop.f32.mrf.mxu1 }
 0x1a4   :  { %v791_v23 = vadd.f32 %v790_v43, %v686_v46  ;;  %v694_v49 = vadd.f32 %v693_v60, %v589_v15  ;;  %v859_v24 = vpop.f32.mrf.mxu2 }
 0x1a5   :  { %v928_v15 = vpop.f32.mrf.mxu3 }
 0x1a6   :  { %v860_v51 = vadd.f32 %v859_v24, %v791_v23 }
 0x1a8   :  { %v929_v34 = vadd.f32 %v928_v15, %v860_v51 }
 0x1ab   :  { %v701_v36 = vpop.f32.mrf.mxu0  ;;  %v794_v59 = vpop.f32.mrf.mxu1 }
 0x1ac   :  { %v795_v25 = vadd.f32 %v794_v59, %v694_v49  ;;  %v702_v4 = vadd.f32 %v701_v36, %v594_v38  ;;  %v864_v52 = vpop.f32.mrf.mxu2 }
 0x1ad   :  { %v934_v54 = vpop.f32.mrf.mxu3 }
 0x1ae   :  { %v865_v13 = vadd.f32 %v864_v52, %v795_v25 }
 0x1b0   :  { %v935_v59 = vadd.f32 %v934_v54, %v865_v13 }
 0x1b3   :  { %v709_v57 = vpop.f32.mrf.mxu0  ;;  %v798_v20 = vpop.f32.mrf.mxu1 }
 0x1b4   :  { %v3176_v50 = vadd.f32 %v798_v20, %v702_v4  ;;  %v710_v44 = vadd.f32 %v709_v57, %v599_v41 }
 0x1bb   :  { %v3178_v55 = vpop.f32.mrf.mxu0  ;;  %v802_v32 = vpop.f32.mrf.mxu1 }
 0x1bc   :  { %v3180_v14 = vadd.f32 %v802_v32, %v710_v44  ;;  %v869_v44 = vpop.f32.mrf.mxu2 }
 0x1bd   :  { %v870_v63 = vadd.f32 %v869_v44, %v3176_v50 }
 0x1c3   :  { %v3182_v62 = vpop.f32.mrf.mxu1  ;;  %v997_v5 = vpop.f32.mrf.mxu0 }
 0x1c4   :  { %v998_v7 = vadd.f32 %v997_v5, %v911_v9 }
 0x1cb   :  { %v1001_v27 = vpop.f32.mrf.mxu0  ;;  %v1054_v58 = vpop.f32.mrf.mxu1 }
 0x1cc   :  { %v3184_v40 = vadd.f32 %v1054_v58, %v998_v7  ;;  %v1002_v22 = vadd.f32 %v1001_v27, %v917_v12  ;;  %v940_v12 = vpop.f32.mrf.mxu3 }
 0x1ce   :  { %v3187_v19 = vmul.f32 0.70710677, %v3184_v40 }
 0x1d0   :  { %v1101_v10 = vmul.f32 %v3187_v19, %v3187_v19 }
 0x1d2   :  { %v3196_v30 = vmin.f32 %v1101_v10, 16.0 }
 0x1d3   :  { %v1058_v21 = vpop.f32.mrf.mxu1  ;;  %v1005_v45 = vpop.f32.mrf.mxu0 }
 0x1d4   :  { %v3189_v17 = vadd.f32 %v1058_v21, %v1002_v22  ;;  %v1006_v6 = vadd.f32 %v1005_v45, %v923_v29  ;;  %v1114_v61 = vmul.f32 3.8918573e-05, %v3196_v30  ;;  %v1103_v35 = vmul.f32 2.1237322e-06, %v3196_v30 }
 0x1d6   :  { %v3194_v26 = vmul.f32 0.70710677, %v3189_v17  ;;  %v1115_v38 = vadd.f32 0.001143296, %v1114_v61  ;;  %v1104_v46 = vadd.f32 0.00028619796, %v1103_v35  ;;  %v874_v61 = vpop.f32.mrf.mxu2 }
 0x1d7   :  { %v875_v54 = vadd.f32 %v874_v61, %v3180_v14 }
 0x1d8   :  { %v1141_v0 = vmul.f32 %v3194_v26, %v3194_v26  ;;  %v1116_v42 = vmul.f32 %v1115_v38, %v3196_v30  ;;  %v1105_v57 = vmul.f32 %v1104_v46, %v3196_v30 }
 0x1da   :  { %v3203_v37 = vmin.f32 %v1141_v0, 16.0  ;;  %v1117_v23 = vadd.f32 0.014752088, %v1116_v42  ;;  %v1106_v58 = vadd.f32 0.0036580483, %v1105_v57  ;;  %v718_v57 = vadd.f32 %v3178_v55, %v3174_v8 }
 0x1db   :  { %v1062_v41 = vpop.f32.mrf.mxu1  ;;  %v1009_v31 = vpop.f32.mrf.mxu0 }
 0x1dc   :  { %v3200_v1 = vadd.f32 %v1062_v41, %v1006_v6  ;;  %v1010_v33 = vadd.f32 %v1009_v31, %v929_v34  ;;  %v1154_v39 = vmul.f32 3.8918573e-05, %v3203_v37  ;;  %v1118_v32 = vmul.f32 %v1117_v23, %v3196_v30 }
 0x1dd   :  { %v1143_v2 = vmul.f32 2.1237322e-06, %v3203_v37  ;;  %v1107_v10 = vmul.f32 %v1106_v58, %v3196_v30  ;;  %v941_v41 = vadd.f32 %v940_v12, %v870_v63 }
 0x1de   :  { %v3206_v28 = vmul.f32 0.70710677, %v3200_v1  ;;  %v1155_v56 = vadd.f32 0.001143296, %v1154_v39  ;;  %v1119_v18 = vadd.f32 0.112945676, %v1118_v32  ;;  %v879_v12 = vpop.f32.mrf.mxu2 }
 0x1df   :  { %v1144_v21 = vadd.f32 0.00028619796, %v1143_v2  ;;  %v807_v2 = vadd.f32 %v3182_v62, %v718_v57 }
 0x1e0   :  { %v1181_v48 = vmul.f32 %v3206_v28, %v3206_v28  ;;  %v1156_v4 = vmul.f32 %v1155_v56, %v3203_v37  ;;  %v1120_v51 = vmul.f32 %v1119_v18, %v3196_v30  ;;  %v946_v56 = vpop.f32.mrf.mxu3 }
 0x1e1   :  { %v1145_v15 = vmul.f32 %v1144_v21, %v3203_v37  ;;  %v947_v32 = vadd.f32 %v946_v56, %v875_v54 }
 0x1e2   :  { %v3218_v60 = vmin.f32 %v1181_v48, 16.0  ;;  %v1157_v47 = vadd.f32 0.014752088, %v1156_v4  ;;  %v1121_v52 = vadd.f32 0.4994258, %v1120_v51 }
 0x1e3   :  { %v1066_v9 = vpop.f32.mrf.mxu1  ;;  %v1013_v49 = vpop.f32.mrf.mxu0  ;;  %v1146_v48 = vadd.f32 0.0036580483, %v1145_v15 }
 0x1e4   :  { %v3208_v3 = vadd.f32 %v1066_v9, %v1010_v33  ;;  %v1194_v20 = vmul.f32 3.8918573e-05, %v3218_v60  ;;  %v1014_v5 = vadd.f32 %v1013_v49, %v935_v59  ;;  %v1158_v45 = vmul.f32 %v1157_v47, %v3203_v37 }
 0x1e5   :  { %v1108_v33 = vadd.f32 0.05243302, %v1107_v10  ;;  %v1183_v42 = vmul.f32 2.1237322e-06, %v3218_v60  ;;  %v1147_v14 = vmul.f32 %v1146_v48, %v3203_v37 }
 0x1e6   :  { %v3215_v16 = vmul.f32 0.70710677, %v3208_v3  ;;  %v1195_v11 = vadd.f32 0.001143296, %v1194_v20  ;;  %v1159_v31 = vadd.f32 0.112945676, %v1158_v45  ;;  %v1122_v20 = vmul.f32 %v1121_v52, %v3196_v30 }
 0x1e7   :  { %v1148_v45 = vadd.f32 0.05243302, %v1147_v14 }
 0x1e8   :  { %v1221_v43 = vmul.f32 %v3215_v16, %v3215_v16  ;;  %v1196_v24 = vmul.f32 %v1195_v11, %v3218_v60  ;;  %v1160_v46 = vmul.f32 %v1159_v31, %v3203_v37  ;;  %v3267_v21 = vadd.f32 1.0, %v1122_v20 }
 0x1e9   :  { %v1149_v31 = vmul.f32 %v1148_v45, %v3203_v37 }
 0x1ea   :  { %v3222_v36 = vmin.f32 %v1221_v43, 16.0  ;;  %v1197_v38 = vadd.f32 0.014752088, %v1196_v24  ;;  %v1109_v43 = vmul.f32 %v1108_v33, %v3196_v30  ;;  %2469 = vrcp.f32 %v3267_v21 }
 0x1eb   :  { %v1070_v25 = vpop.f32.mrf.mxu1  ;;  %v1017_v29 = vpop.f32.mrf.mxu0  ;;  %vm1129_vm2 = vweird.f32 %v3267_v21 }
 0x1ec   :  { %v1234_v7 = vmul.f32 3.8918573e-05, %v3222_v36  ;;  %v3230_v27 = vadd.f32 %v1070_v25, %v1014_v5  ;;  %v1018_v34 = vadd.f32 %v1017_v29, %v941_v41  ;;  %v1198_v23 = vmul.f32 %v1197_v38, %v3218_v60 }
 0x1ed   :  { %v1184_v25 = vadd.f32 0.00028619796, %v1183_v42  ;;  %v1161_v5 = vadd.f32 0.4994258, %v1160_v46  ;;  %v1110_v47 = vadd.f32 0.18741608, %v1109_v43  ;;  %v880_v29 = vadd.f32 %v879_v12, %v807_v2 }
 0x1ee   :  { %v1235_v22 = vadd.f32 0.001143296, %v1234_v7  ;;  %v3235_v53 = vmul.f32 0.70710677, %v3230_v27  ;;  %v1199_v58 = vadd.f32 0.112945676, %v1198_v23 }
 0x1ef   :  { %v1223_v11 = vmul.f32 2.1237322e-06, %v3222_v36  ;;  %v1185_v10 = vmul.f32 %v1184_v25, %v3218_v60  ;;  %v1162_v24 = vmul.f32 %v1161_v5, %v3203_v37  ;;  %v1111_v41 = vmul.f32 %v1110_v47, %v3196_v30 }
 0x1f0   :  { %v1236_v6 = vmul.f32 %v1235_v22, %v3222_v36  ;;  %v1261_v50 = vmul.f32 %v3235_v53, %v3235_v53  ;;  %v1200_v51 = vmul.f32 %v1199_v58, %v3218_v60  ;;  %v3296_v5 = vpop.eup %2469 }
 0x1f1   :  { %v1224_v15 = vadd.f32 0.00028619796, %v1223_v11  ;;  %v3281_v38 = vadd.f32 1.0, %v1162_v24  ;;  %v1112_v48 = vadd.f32 1.1283791, %v1111_v41  ;;  %v1125_v45 = vmul.f32 %v3296_v5, %v3267_v21 }
 0x1f2   :  { %v3244_v9 = vmin.f32 %v1261_v50, 16.0  ;;  %v1237_v39 = vadd.f32 0.014752088, %v1236_v6  ;;  %v952_v50 = vpop.f32.mrf.mxu3  ;;  %v1201_v42 = vadd.f32 0.4994258, %v1200_v51  ;;  %vm1130_vm1 = vweird.f32 %v3296_v5 }
 0x1f3   :  { %v1074_v0 = vpop.f32.mrf.mxu1  ;;  %v1021_v44 = vpop.f32.mrf.mxu0  ;;  %v1225_v56 = vmul.f32 %v1224_v15, %v3222_v36  ;;  %2471 = vrcp.f32 %v3281_v38  ;;  %v1133_v41 = vand.u32 2147483647, %v3267_v21  ;;  %vm1169_vm3 = vweird.f32 %v3281_v38  ;;  %vm3383_vm4 = vmor %vm1129_vm2, %vm1130_vm1 }
 0x1f4   :  { %v3246_v35 = vadd.f32 %v1074_v0, %v1018_v34  ;;  %v1274_v13 = vmul.f32 3.8918573e-05, %v3244_v9  ;;  %v1238_v49 = vmul.f32 %v1237_v39, %v3222_v36  ;;  %v1022_v55 = vadd.f32 %v1021_v44, %v947_v32 }
 0x1f5   :  { %v1186_v34 = vadd.f32 0.0036580483, %v1185_v10  ;;  %v953_v39 = vadd.f32 %v952_v50, %v880_v29  ;;  %v1263_v57 = vmul.f32 2.1237322e-06, %v3244_v9  ;;  %v1202_v2 = vmul.f32 %v1201_v42, %v3218_v60 }
 0x1f6   :  { %v1275_v59 = vadd.f32 0.001143296, %v1274_v13  ;;  %v3256_v4 = vmul.f32 0.70710677, %v3246_v35  ;;  %v1239_v18 = vadd.f32 0.112945676, %v1238_v49 }
 0x1f7   :  { %v1150_v49 = vadd.f32 0.18741608, %v1149_v31  ;;  %v1226_v58 = vadd.f32 0.0036580483, %v1225_v56 }
 0x1f8   :  { %v1276_v7 = vmul.f32 %v1275_v59, %v3244_v9  ;;  %v1301_v22 = vmul.f32 %v3256_v4, %v3256_v4  ;;  %v1240_v0 = vmul.f32 %v1239_v18, %v3222_v36  ;;  %v1187_v59 = vmul.f32 %v1186_v34, %v3218_v60 }
 0x1f9   :  { %v3306_v18 = vmul.f32 %v1112_v48, %v3187_v19  ;;  %v1151_v10 = vmul.f32 %v1150_v49, %v3203_v37  ;;  %v3319_v50 = vpop.eup %2471  ;;  %v1227_v15 = vmul.f32 %v1226_v58, %v3222_v36  ;;  %v1126_v48 = vsub.f32 1.0, %v1125_v45 }
 0x1fa   :  { %v1277_v8 = vadd.f32 0.014752088, %v1276_v7  ;;  %v3277_v61 = vmin.f32 %v1301_v22, 16.0  ;;  %v1241_v46 = vadd.f32 0.4994258, %v1240_v0  ;;  %v1135_v7 = vand.u32 2147483648, %v3267_v21 }
 0x1fb   :  { %v1078_v63 = vpop.f32.mrf.mxu1  ;;  %v1025_v54 = vpop.f32.mrf.mxu0  ;;  %v1188_v24 = vadd.f32 0.05243302, %v1187_v59  ;;  %v1152_v42 = vadd.f32 1.1283791, %v1151_v10  ;;  %vm1170_vm5 = vweird.f32 %v3319_v50 }
 0x1fc   :  { %v3271_v62 = vadd.f32 %v1078_v63, %v1022_v55  ;;  %v1278_v6 = vmul.f32 %v1277_v8, %v3244_v9  ;;  %v1314_v30 = vmul.f32 3.8918573e-05, %v3277_v61  ;;  %v1303_v20 = vmul.f32 2.1237322e-06, %v3277_v61  ;;  %vm3412_vm6 = vmor %vm1169_vm3, %vm1170_vm5 }
 0x1fd   :  { %v1026_v32 = vadd.f32 %v1025_v54, %v953_v39  ;;  %v1242_v11 = vmul.f32 %v1241_v46, %v3222_v36  ;;  %v1264_v8 = vadd.f32 0.00028619796, %v1263_v57  ;;  %v3314_v51 = vor.u32 1.1754944e-38, %v1135_v7 }
 0x1fe   :  { %v1279_v33 = vadd.f32 0.112945676, %v1278_v6  ;;  %v3285_v52 = vmul.f32 0.70710677, %v3271_v62  ;;  %v1315_v43 = vadd.f32 0.001143296, %v1314_v30  ;;  %v1165_v54 = vmul.f32 %v3319_v50, %v3281_v38 }
 0x1ff   :  { %v1304_v22 = vadd.f32 0.00028619796, %v1303_v20  ;;  %v3316_v6 = vadd.f32 1.0, %v1202_v2  ;;  %v3322_v0 = vadd.f32 1.0, %v1242_v11  ;;  %v1265_v34 = vmul.f32 %v1264_v8, %v3244_v9 }
 0x200   :  { %v1280_v13 = vmul.f32 %v1279_v33, %v3244_v9  ;;  %v1341_v23 = vmul.f32 %v3285_v52, %v3285_v52  ;;  %v1316_v44 = vmul.f32 %v1315_v43, %v3277_v61  ;;  %v1228_v43 = vadd.f32 0.05243302, %v1227_v15 }
 0x201   :  { %v1305_v30 = vmul.f32 %v1304_v22, %v3277_v61  ;;  %2473 = vrcp.f32 %v3316_v6  ;;  %v1266_v59 = vadd.f32 0.0036580483, %v1265_v34  ;;  %v1166_v7 = vsub.f32 1.0, %v1165_v54 }
 0x202   :  { %v1281_v25 = vadd.f32 0.4994258, %v1280_v13  ;;  %v3300_v47 = vmin.f32 %v1341_v23, 16.0  ;;  %v1317_v63 = vadd.f32 0.014752088, %v1316_v44  ;;  %v1189_v13 = vmul.f32 %v1188_v24, %v3218_v60 }
 0x203   :  { %v1082_v14 = vpop.f32.mrf.mxu1  ;;  %2475 = vrcp.f32 %v3322_v0  ;;  %v1306_v57 = vadd.f32 0.0036580483, %v1305_v30  ;;  %v1175_v2 = vand.u32 2147483648, %v3281_v38  ;;  %v1267_v10 = vmul.f32 %v1266_v59, %v3244_v9 }
 0x204   :  { %v3303_v12 = vadd.f32 %v1082_v14, %v1026_v32  ;;  %v1282_v55 = vmul.f32 %v1281_v25, %v3244_v9  ;;  %v1318_v29 = vmul.f32 %v1317_v63, %v3277_v61  ;;  %v1343_v19 = vmul.f32 2.1237322e-06, %v3300_v47 }
 0x205   :  { %v1354_v31 = vmul.f32 3.8918573e-05, %v3300_v47  ;;  %v1127_v14 = vmul.f32 %v3296_v5, %v1126_v48  ;;  %v3345_v25 = vmul.f32 %v1152_v42, %v3194_v26  ;;  %v1190_v58 = vadd.f32 0.18741608, %v1189_v13 }
 0x206   :  { %v3326_v37 = vmul.f32 0.70710677, %v3303_v12  ;;  %v3329_v33 = vadd.f32 1.0, %v1282_v55  ;;  %v1319_v39 = vadd.f32 0.112945676, %v1318_v29  ;;  %v1229_v63 = vmul.f32 %v1228_v43, %v3222_v36 }
 0x207   :  { %v1344_v46 = vadd.f32 0.00028619796, %v1343_v19  ;;  %v1355_v23 = vadd.f32 0.001143296, %v1354_v31  ;;  %v3355_v45 = vpop.eup %2473  ;;  %v1307_v24 = vmul.f32 %v1306_v57, %v3277_v61  ;;  %v3365_v15 = vadd.f32 %v3296_v5, %v1127_v14 }
 0x208   :  { %v1320_v56 = vmul.f32 %v1319_v39, %v3277_v61  ;;  %v1381_v49 = vmul.f32 %v3326_v37, %v3326_v37  ;;  %2477 = vrcp.f32 %v3329_v33  ;;  %v1167_v48 = vmul.f32 %v3319_v50, %v1166_v7 }
 0x209   :  { %v1356_v44 = vmul.f32 %v1355_v23, %v3300_v47  ;;  %v1345_v11 = vmul.f32 %v1344_v46, %v3300_v47  ;;  %v3362_v19 = vpop.eup %2475  ;;  %v3373_v42 = vor.u32 1.1754944e-38, %v1175_v2  ;;  %v1205_v46 = vmul.f32 %v3355_v45, %v3316_v6 }
 0x20a   :  { %v1321_v20 = vadd.f32 0.4994258, %v1320_v56  ;;  %v3348_v32 = vmin.f32 %v1381_v49, 16.0  ;;  %v1191_v56 = vmul.f32 %v1190_v58, %v3218_v60  ;;  %v1230_v43 = vadd.f32 0.18741608, %v1229_v63 }
 0x20b   :  { %v1357_v55 = vadd.f32 0.014752088, %v1356_v44  ;;  %v1346_v13 = vadd.f32 0.0036580483, %v1345_v11  ;;  %v1245_v49 = vmul.f32 %v3362_v19, %v3322_v0  ;;  %v1268_v59 = vadd.f32 0.05243302, %v1267_v10 }
 0x20c   :  { %v1322_v8 = vmul.f32 %v1321_v20, %v3277_v61  ;;  %v1383_v22 = vmul.f32 2.1237322e-06, %v3348_v32  ;;  %v1394_v29 = vmul.f32 3.8918573e-05, %v3348_v32  ;;  %v1308_v57 = vadd.f32 0.05243302, %v1307_v24 }
 0x20d   :  { %v1358_v34 = vmul.f32 %v1357_v55, %v3300_v47  ;;  %v3398_v2 = vadd.f32 %v3319_v50, %v1167_v48  ;;  %v1347_v58 = vmul.f32 %v1346_v13, %v3300_v47  ;;  %v3403_v63 = vadd.f32 1.1283791, %v1191_v56 }
 0x20e   :  { %v3367_v31 = vadd.f32 1.0, %v1322_v8  ;;  %v1384_v30 = vadd.f32 0.00028619796, %v1383_v22  ;;  %v3370_v39 = vpop.eup %2477  ;;  %v1395_v54 = vadd.f32 0.001143296, %v1394_v29  ;;  %v1206_v8 = vsub.f32 1.0, %v1205_v46 }
 0x20f   :  { %v1359_v60 = vadd.f32 0.112945676, %v1358_v34  ;;  %v1285_v14 = vmul.f32 %v3370_v39, %v3329_v33  ;;  %v1231_v55 = vmul.f32 %v1230_v43, %v3222_v36  ;;  %v1246_v10 = vsub.f32 1.0, %v1245_v49 }
 0x210   :  { %2479 = vrcp.f32 %v3367_v31  ;;  %v1385_v44 = vmul.f32 %v1384_v30, %v3348_v32  ;;  %v1396_v7 = vmul.f32 %v1395_v54, %v3348_v32  ;;  %v1269_v24 = vmul.f32 %v1268_v59, %v3244_v9 }
 0x211   :  { %v1360_v11 = vmul.f32 %v1359_v60, %v3300_v47  ;;  %v1309_v29 = vmul.f32 %v1308_v57, %v3277_v61  ;;  %v1213_v13 = vand.u32 2147483647, %v3316_v6  ;;  %v1286_v54 = vsub.f32 1.0, %v1285_v14 }
 0x212   :  { %v1397_v22 = vadd.f32 0.014752088, %v1396_v7  ;;  %v1386_v56 = vadd.f32 0.0036580483, %v1385_v44  ;;  %vm1209_vm7 = vweird.f32 %v3316_v6  ;;  %v1348_v59 = vadd.f32 0.05243302, %v1347_v58 }
 0x213   :  { %v1361_v34 = vadd.f32 0.4994258, %v1360_v11  ;;  %v1207_v57 = vmul.f32 %v3355_v45, %v1206_v8  ;;  %v3427_v60 = vadd.f32 1.1283791, %v1231_v55  ;;  %v1247_v7 = vmul.f32 %v3362_v19, %v1246_v10 }
 0x214   :  { %v1398_v36 = vmul.f32 %v1397_v22, %v3348_v32  ;;  %v1270_v11 = vadd.f32 0.18741608, %v1269_v24  ;;  %v1310_v22 = vadd.f32 0.18741608, %v1309_v29  ;;  %v1287_v20 = vmul.f32 %v3370_v39, %v1286_v54 }
 0x215   :  { %v1362_v14 = vmul.f32 %v1361_v34, %v3300_v47  ;;  %v1387_v43 = vmul.f32 %v1386_v56, %v3348_v32  ;;  %vm1210_vm9 = vweird.f32 %v3355_v45  ;;  %vm1249_vm10 = vweird.f32 %v3322_v0 }
 0x216   :  { %v3408_v30 = vpop.eup %2479  ;;  %v1399_v44 = vadd.f32 0.112945676, %v1398_v36  ;;  %v1349_v55 = vmul.f32 %v1348_v59, %v3300_v47  ;;  %v3441_v10 = vadd.f32 %v3355_v45, %v1207_v57  ;;  %v1253_v24 = vand.u32 2147483647, %v3322_v0  ;;  %vm3459_vm14 = vmor %vm1209_vm7, %vm1210_vm9 }
 0x217   :  { %v1325_v49 = vmul.f32 %v3408_v30, %v3367_v31  ;;  %v3432_v26 = vadd.f32 1.0, %v1362_v14  ;;  %v1255_v29 = vand.u32 2147483648, %v3322_v0  ;;  %vm1250_vm11 = vweird.f32 %v3362_v19 }
 0x218   :  { %v1400_v58 = vmul.f32 %v1399_v44, %v3348_v32  ;;  %v1271_v34 = vmul.f32 %v1270_v11, %v3244_v9  ;;  %v1311_v54 = vmul.f32 %v1310_v22, %v3277_v61  ;;  %v1248_v36 = vadd.f32 %v3362_v19, %v1247_v7  ;;  %vm3500_vm7 = vmor %vm1249_vm10, %vm1250_vm11 }
 0x219   :  { %v1326_v46 = vsub.f32 1.0, %v1325_v49  ;;  %2481 = vrcp.f32 %v3432_v26  ;;  %vm1290_vm12 = vweird.f32 %v3370_v39  ;;  %v1388_v49 = vadd.f32 0.05243302, %v1387_v43 }
 0x21a   :  { %v1401_v56 = vadd.f32 0.4994258, %v1400_v58  ;;  %vm1330_vm13 = vweird.f32 %v3408_v30  ;;  %v1350_v57 = vadd.f32 0.18741608, %v1349_v55  ;;  %vm1289_vm15 = vweird.f32 %v3329_v33 }
 0x21b   :  { %v1327_v8 = vmul.f32 %v3408_v30, %v1326_v46  ;;  %v1288_v46 = vadd.f32 %v3370_v39, %v1287_v20  ;;  %v1293_v61 = vand.u32 2147483647, %v3329_v33  ;;  %v1295_v20 = vand.u32 2147483648, %v3329_v33  ;;  %vm3471_vm1 = vmor %vm1289_vm15, %vm1290_vm12 }
 0x21c   :  { %v1402_v14 = vmul.f32 %v1401_v56, %v3348_v32  ;;  %v1335_v43 = vand.u32 2147483648, %v3367_v31  ;;  %vm3467_vm0 = vcmp.eq.f32.partialorder %v1213_v13, 8.507059e+37  ;;  %v1312_v11 = vadd.f32 1.1283791, %v1311_v54 }
 0x21d   :  { %v1328_v59 = vadd.f32 %v3408_v30, %v1327_v8  ;;  %vm1329_vm2 = vweird.f32 %v3367_v31  ;;  %v1333_v22 = vand.u32 2147483647, %v3367_v31  ;;  %v1212_v33 = vsel %vm3459_vm14, %v3355_v45, %v3441_v10 }
 0x21e   :  { %v3477_v58 = vadd.f32 1.0, %v1402_v14  ;;  %v1256_v13 = vor.u32 1.1754944e-38, %v1255_v29  ;;  %v1272_v55 = vadd.f32 1.1283791, %v1271_v34  ;;  %vm3485_vm3 = vmor %vm1329_vm2, %vm1330_vm13  ;;  %v1389_v54 = vmul.f32 %v1388_v49, %v3348_v32 }
 0x21f   :  { %v2482_v8 = vpop.eup %2481  ;;  %vm3492_vm5 = vcmp.eq.f32.partialorder %v1133_v41, 8.507059e+37  ;;  %v1292_v10 = vsel %vm3471_vm1, %v3370_v39, %v1288_v46  ;;  %v1332_v21 = vsel %vm3485_vm3, %v3408_v30, %v1328_v59  ;;  %v1351_v41 = vmul.f32 %v1350_v57, %v3300_v47 }
 0x220   :  { %v1365_v29 = vmul.f32 %v2482_v8, %v3432_v26  ;;  %v4038_v34 = vand.u32 2147483647, %v3281_v38  ;;  %v1252_v49 = vsel %vm3500_vm7, %v3362_v19, %v1248_v36  ;;  %v1296_v14 = vor.u32 1.1754944e-38, %v1295_v20 }
 0x221   :  { %v1336_v39 = vor.u32 1.1754944e-38, %v1335_v43  ;;  %2483 = vrcp.f32 %v3477_v58  ;;  %vm1294_vm10 = vcmp.eq.f32.partialorder %v1293_v61, 8.507059e+37  ;;  %v1313_v30 = vmul.f32 %v1312_v11, %v3256_v4 }
 0x222   :  { %vm3514_vm9 = vcmp.eq.f32.partialorder %v4038_v34, 8.507059e+37  ;;  %vm1334_vm11 = vcmp.eq.f32.partialorder %v1333_v22, 8.507059e+37  ;;  %v1366_v47 = vsub.f32 1.0, %v1365_v29  ;;  %v1297_v46 = vsel %vm1294_vm10, %v1296_v14, %v1292_v10 }
 0x223   :  { %v1337_v59 = vsel %vm1334_vm11, %v1336_v39, %v1332_v21  ;;  %v1375_v38 = vand.u32 2147483648, %v3432_v26  ;;  %v1390_v57 = vadd.f32 0.18741608, %v1389_v54  ;;  %v1352_v9 = vadd.f32 1.1283791, %v1351_v41 }
 0x224   :  { %v1367_v7 = vmul.f32 %v2482_v8, %v1366_v47  ;;  %vm1370_vm12 = vweird.f32 %v2482_v8  ;;  %v1373_v56 = vand.u32 2147483647, %v3432_v26  ;;  %v4041_v19 = vand.u32 2147483648, %v3316_v6 }
 0x225   :  { %v1233_v61 = vmul.f32 %v3427_v60, %v3215_v16  ;;  %vm1254_vm13 = vcmp.eq.f32.partialorder %v1253_v24, 8.507059e+37  ;;  %v1273_v4 = vmul.f32 %v1272_v55, %v3235_v53  ;;  %v1338_v43 = vmul.f32 %v1337_v59, %v1313_v30 }
 0x226   :  { %v1216_v36 = vor.u32 1.1754944e-38, %v4041_v19  ;;  %v1257_v20 = vsel %vm1254_vm13, %v1256_v13, %v1252_v49  ;;  %v1368_v11 = vadd.f32 %v2482_v8, %v1367_v7  ;;  %vm1369_vm14 = vweird.f32 %v3432_v26 }
 0x227   :  { %v2484_v22 = vpop.eup %2483  ;;  %v1298_v45 = vmul.f32 %v1297_v46, %v1273_v4  ;;  %vm1371_vm15 = vmor %vm1369_vm14, %vm1370_vm12  ;;  %v1376_v10 = vor.u32 1.1754944e-38, %v1375_v38  ;;  %v1391_v6 = vmul.f32 %v1390_v57, %v3348_v32  ;;  %v1353_v21 = vmul.f32 %v1352_v9, %v3285_v52 }
 0x228   :  { %v1217_v54 = vsel %vm3467_vm0, %v1216_v36, %v1212_v33  ;;  %v1372_v16 = vsel %vm1371_vm15, %v2482_v8, %v1368_v11  ;;  %vm1374_vm1 = vcmp.eq.f32.partialorder %v1373_v56, 8.507059e+37  ;;  %v1405_v53 = vmul.f32 %v2484_v22, %v3477_v58 }
 0x229   :  { %v4042_v26 = vsel %vm3383_vm4, %v3296_v5, %v3365_v15  ;;  %v1193_v24 = vmul.f32 %v3403_v63, %v3206_v28  ;;  %v1258_v44 = vmul.f32 %v1257_v20, %v1233_v61  ;;  %v1377_v32 = vsel %vm1374_vm1, %v1376_v10, %v1372_v16 }
 0x22a   :  { %v1137_v60 = vsel %vm3492_vm5, %v3314_v51, %v4042_v26  ;;  %v4043_v52 = vsel %vm3412_vm6, %v3319_v50, %v3398_v2  ;;  %v2430_v8 = vclamps-f32 %v1338_v43, 1.0  ;;  %v1378_v5 = vmul.f32 %v1377_v32, %v1353_v21 }
 0x22b   :  { %v1177_v23 = vsel %vm3514_vm9, %v3373_v42, %v4043_v52  ;;  %v1406_v15 = vsub.f32 1.0, %v1405_v53  ;;  %v1218_v33 = vmul.f32 %v1217_v54, %v1193_v24  ;;  %v2429_v13 = vclamps-f32 %v1298_v45, 1.0 }
 0x22c   :  { %v1392_v51 = vadd.f32 1.1283791, %v1391_v6  ;;  %v1415_v55 = vand.u32 2147483648, %v3477_v58  ;;  %v2431_v28 = vclamps-f32 %v1378_v5, 1.0  ;;  %vm1410_vm4 = vweird.f32 %v2484_v22 }
 0x22d   :  { %v1407_v63 = vmul.f32 %v2484_v22, %v1406_v15  ;;  %v1413_v48 = vand.u32 2147483647, %v3477_v58  ;;  %v1138_v31 = vmul.f32 %v1137_v60, %v3306_v18  ;;  %v1178_v50 = vmul.f32 %v1177_v23, %v3345_v25 }
 0x22e   :  { %v2428_v2 = vclamps-f32 %v1258_v44, 1.0  ;;  %v1091_v42 = vmul.f32 0.5, %v3271_v62  ;;  %v1426_v41 = vadd.f32 1.0, %v2430_v8  ;;  %v1427_v29 = vadd.f32 1.0, %v2431_v28 }
 0x22f   :  { %v1408_v34 = vadd.f32 %v2484_v22, %v1407_v63  ;;  %vm1409_vm6 = vweird.f32 %v3477_v58  ;;  %v2427_v0 = vclamps-f32 %v1218_v33, 1.0  ;;  %v1425_v49 = vadd.f32 1.0, %v2429_v13  ;;  %v1437_v58 = vld [vmem:[%s4011_s5] sm:$0xff] }
 0x230   :  { %v1090_v14 = vmul.f32 0.5, %v3246_v35  ;;  %vm1411_vm0 = vmor %vm1409_vm6, %vm1410_vm4  ;;  %v1416_v39 = vor.u32 1.1754944e-38, %v1415_v55  ;;  %v1435_v30 = vmul.f32 %v1427_v29, %v1091_v42  ;;  %v1393_v47 = vmul.f32 %v1392_v51, %v3326_v37  ;;  %v1439_v29 = vld [vmem:[%s4011_s5 + $0x10] sm:$0xff] }
 0x231   :  { %v1412_v18 = vsel %vm1411_vm0, %v2484_v22, %v1408_v34  ;;  %vm1414_vm2 = vcmp.eq.f32.partialorder %v1413_v48, 8.507059e+37  ;;  %v2426_v25 = vclamps-f32 %v1178_v50, 1.0  ;;  %v1089_v46 = vmul.f32 0.5, %v3230_v27 }
 0x232   :  { %v1417_v62 = vsel %vm1414_vm2, %v1416_v39, %v1412_v18  ;;  %v1424_v59 = vadd.f32 1.0, %v2428_v2  ;;  %v1434_v38 = vmul.f32 %v1426_v41, %v1090_v14  ;;  %v2425_v9 = vclamps-f32 %v1138_v31, 1.0 }
 0x233   :  { %v1418_v57 = vmul.f32 %v1417_v62, %v1393_v47  ;;  %v1423_v35 = vadd.f32 1.0, %v2427_v0  ;;  %v1433_v7 = vmul.f32 %v1425_v49, %v1089_v46  ;;  %v1088_v56 = vmul.f32 0.5, %v3208_v3 }
 0x234   :  { %v3567_v19 = vand.u32 4294901760, %v1435_v30  ;;  %v1422_v36 = vadd.f32 1.0, %v2426_v25  ;;  %v1087_v61 = vmul.f32 0.5, %v3200_v1  ;;  %v1494_v27 = vsel %vm606_vm8, %v1437_v58, 0 }
 0x235   :  { %v2432_v37 = vclamps-f32 %v1418_v57, 1.0  ;;  %v1432_v4 = vmul.f32 %v1424_v59, %v1088_v56  ;;  %v3571_v20 = vand.u32 4294901760, %v1434_v38  ;;  %v1092_v43 = vmul.f32 0.5, %v3303_v12  ;;  %v1440_v56 = vld [vmem:[%s4011_s5 + $0x18] sm:$0xff] }
 0x236   :  { %v1421_v22 = vadd.f32 1.0, %v2425_v9  ;;  %v1431_v54 = vmul.f32 %v1423_v35, %v1087_v61  ;;  %v3574_v45 = vand.u32 4294901760, %v1433_v7  ;;  %v1086_v3 = vmul.f32 0.5, %v3189_v17  ;;  %v1438_v17 = vld [vmem:[%s4011_s5 + $0x8] sm:$0xff] }
 0x237   :  { %v1428_v11 = vadd.f32 1.0, %v2432_v37  ;;  %v3578_v6 = vsub.f32 %v1435_v30, %v3567_v19  ;;  %v3580_v21 = vand.u32 4294901760, %v1494_v27  ;;  %v1085_v1 = vmul.f32 0.5, %v3184_v40 }
 0x238   :  { %v1430_v16 = vmul.f32 %v1422_v36, %v1086_v3  ;;  %v3583_v53 = vand.u32 4294901760, %v1432_v4  ;;  %v3588_v12 = vsub.f32 %v1434_v38, %v3571_v20  ;;  %v3593_v24 = vand.u32 4294901760, %v1431_v54 }
 0x239   :  { %v1436_v10 = vmul.f32 %v1428_v11, %v1092_v43  ;;  %v1429_v60 = vmul.f32 %v1421_v22, %v1085_v1  ;;  %v3596_v44 = vsub.f32 %v1433_v7, %v3574_v45  ;;  %v1622_v32 = vand.u32 4294901760, %v3578_v6 }
 0x23a   :  { %v3605_v52 = vsub.f32 %v1494_v27, %v3580_v21  ;;  %v1497_v23 = vsel %vm606_vm8, %v1438_v17, 0  ;;  %v3608_v8 = vand.u32 4294901760, %v1430_v16  ;;  %v3614_v15 = vsub.f32 %v1432_v4, %v3583_v53 }
 0x23b   :  { %v3585_v26 = vand.u32 4294901760, %v1436_v10  ;;  %v1628_v33 = vand.u32 4294901760, %v3588_v12  ;;  %v3617_v13 = vand.u32 4294901760, %v1429_v60  ;;  %v3621_v51 = vsub.f32 %v1431_v54, %v3593_v24 }
 0x23c   :  { %v1634_v55 = vand.u32 4294901760, %v3596_v44  ;;  %v1623_v63 = vsub.f32 %v3578_v6, %v1622_v32  ;;  %v1543_v48 = vand.u32 4294901760, %v3605_v52  ;;  %v3633_v31 = vand.u32 4294901760, %v1497_v23 }
 0x23d   :  { %v3599_v40 = vsub.f32 %v1436_v10, %v3585_v26  ;;  %1526 = vmatpush.msrb.mxu2 %v3585_v26  ;;  %1777 = vmatpush.msra.mxu1 %v3585_v26  ;;  %v1629_v2 = vsub.f32 %v3588_v12, %v1628_v33  ;;  %v3642_v42 = vsub.f32 %v1430_v16, %v3608_v8  ;;  %v1640_v41 = vand.u32 4294901760, %v3614_v15  ;;  %v1441_v10 = vld [vmem:[%s4011_s5 + $0x20] sm:$0xff] }
 0x23e   :  { %v3650_v34 = vsub.f32 %v1429_v60, %v3617_v13  ;;  %v1646_v0 = vand.u32 4294901760, %v3621_v51  ;;  %v1624_v49 = vand.u32 4294901760, %v1623_v63  ;;  %v1635_v14 = vsub.f32 %v3596_v44, %v1634_v55  ;;  %v1442_v60 = vld [vmem:[%s4011_s5 + $0x28] sm:$0xff] }
 0x23f   :  { %1528 = vmatpush.msrb.mxu2 %v3567_v19  ;;  %1705 = vmatpush.msra.mxu0 %v3599_v40  ;;  %v1616_v5 = vand.u32 4294901760, %v3599_v40  ;;  %v1544_v39 = vsub.f32 %v3605_v52, %v1543_v48  ;;  %v1550_v30 = vsub.f32 %v1497_v23, %v3633_v31  ;;  %v1500_v47 = vsel %vm606_vm8, %v1439_v29, 0 }
 0x240   :  { %1779 = vmatpush.msra.mxu1 %v3567_v19  ;;  %v1630_v18 = vand.u32 4294901760, %v1629_v2  ;;  %v1641_v25 = vsub.f32 %v3614_v15, %v1640_v41  ;;  %v1652_v46 = vand.u32 4294901760, %v3642_v42  ;;  %v1647_v62 = vsub.f32 %v3621_v51, %v1646_v0 }
 0x241   :  { %1530 = vmatpush.msrb.mxu2 %v3571_v20  ;;  %1708 = vmatpush.msra.mxu0 %v3578_v6  ;;  %v1617_v28 = vsub.f32 %v3599_v40, %v1616_v5  ;;  %v1658_v59 = vand.u32 4294901760, %v3650_v34  ;;  %v1636_v38 = vand.u32 4294901760, %v1635_v14  ;;  %v1545_v57 = vand.u32 4294901760, %v1544_v39 }
 0x242   :  { %1781 = vmatpush.msra.mxu1 %v3571_v20  ;;  %v1551_v58 = vand.u32 4294901760, %v1550_v30  ;;  %v3674_v9 = vand.u32 4294901760, %v1500_v47  ;;  %v1642_v35 = vand.u32 4294901760, %v1641_v25  ;;  %v1653_v7 = vsub.f32 %v3642_v42, %v1652_v46 }
 0x243   :  { %1532 = vmatpush.msrb.mxu2 %v3574_v45  ;;  %1711 = vmatpush.msra.mxu0 %v3588_v12  ;;  %v1618_v50 = vand.u32 4294901760, %v1617_v28  ;;  %v1648_v37 = vand.u32 4294901760, %v1647_v62  ;;  %v1659_v36 = vsub.f32 %v3650_v34, %v1658_v59  ;;  %v1503_v4 = vsel %vm606_vm8, %v1440_v56, 0  ;;  %v1466_v62 = vpop.permute.xlu0 %1465 }
 0x244   :  { %1783 = vmatpush.msra.mxu1 %v3574_v45  ;;  %v1552_v61 = vsub.f32 %v1550_v30, %v1551_v58  ;;  %v1558_v27 = vsub.f32 %v1500_v47, %v3674_v9  ;;  %v1654_v43 = vand.u32 4294901760, %v1653_v7  ;;  %v3694_v3 = vand.u32 4294901760, %v1503_v4 }
 0x245   :  { %1534 = vmatpush.msrb.mxu2 %v3583_v53  ;;  %1619 = vmatpush.msrb.mxu3 %v1618_v50  ;;  %v1660_v11 = vand.u32 4294901760, %v1659_v36  ;;  %v1506_v16 = vsel %vm606_vm8, %v1441_v10, 0 }
 0x246   :  { %1714 = vmatpush.msra.mxu0 %v3596_v44  ;;  %1785 = vmatpush.msra.mxu1 %v3583_v53  ;;  %v1553_v22 = vand.u32 4294901760, %v1552_v61  ;;  %v1559_v54 = vand.u32 4294901760, %v1558_v27  ;;  %v1566_v1 = vsub.f32 %v1503_v4, %v3694_v3  ;;  %v1509_v44 = vsel %vm606_vm8, %v1442_v60, 0 }
 0x247   :  { %1536 = vmatpush.msrb.mxu2 %v3593_v24  ;;  %1625 = vmatpush.msrb.mxu3 %v1624_v49 }
 0x248   :  { %1717 = vmatpush.msra.mxu0 %v3614_v15  ;;  %1787 = vmatpush.msra.mxu1 %v3593_v24  ;;  %v1560_v6 = vsub.f32 %v1558_v27, %v1559_v54  ;;  %v1567_v17 = vand.u32 4294901760, %v1566_v1 }
 0x249   :  { %1538 = vmatpush.msrb.mxu2 %v3608_v8  ;;  %1631 = vmatpush.msrb.mxu3 %v1630_v18 }
 0x24a   :  { %1720 = vmatpush.msra.mxu0 %v3621_v51  ;;  %1789 = vmatpush.msra.mxu1 %v3608_v8  ;;  %v1561_v12 = vand.u32 4294901760, %v1560_v6 }
 0x24b   :  { %1540 = vmatpush.msrb.mxu2 %v3617_v13  ;;  %1637 = vmatpush.msrb.mxu3 %v1636_v38  ;;  %v1481_v10 = vpop.permute.xlu0 %1480 }
 0x24c   :  { %1723 = vmatpush.msra.mxu0 %v3642_v42  ;;  %1791 = vmatpush.msra.mxu1 %v3617_v13 }
 0x24d   :  { %1546 = vmatmul.f32.vlgmr.msrb.gmra.mxu2 %v1545_v57  ;;  %1643 = vmatpush.msrb.mxu3 %v1642_v35 }
 0x24e   :  { %1852 = vmatpush.msra.mxu2 %v1616_v5  ;;  %1726 = vmatpush.msra.mxu0 %v3650_v34 }
 0x24f   :  { %1649 = vmatpush.msrb.mxu3 %v1648_v37  ;;  %1729 = vmatmul.f32.vlgmr.msra.gmra.mxu0 %v3605_v52 }
 0x250   :  { %1856 = vmatpush.msra.mxu2 %v1622_v32  ;;  %1795 = vmatmul.f32.vlgmr.msra.gmra.mxu1 %v1543_v48  ;;  %v1581_v32 = vand.u32 4294901760, %v1509_v44 }
 0x251   :  { %1655 = vmatpush.msrb.mxu3 %v1654_v43 }
 0x252   :  { %1860 = vmatpush.msra.mxu2 %v1628_v33  ;;  %v1582_v23 = vsub.f32 %v1509_v44, %v1581_v32  ;;  %v1444_v33 = vld [vmem:[%s4011_s5 + $0x38] sm:$0xff] }
 0x253   :  { %1661 = vmatpush.msrb.mxu3 %v1660_v11 }
 0x254   :  { %1864 = vmatpush.msra.mxu2 %v1634_v55  ;;  %1663 = vmatmul.f32.vlgmr.msrb.gmra.mxu3 %v3580_v21  ;;  %v1515_v55 = vsel %vm606_vm8, %v1444_v33, 0 }
 0x255   :  { %1554 = vmatmul.f32.gmra.mxu2 %v1553_v22  ;;  %1923 = vmatpush.msra.mxu3 %v3585_v26  ;;  %v3713_v26 = vand.u32 4294901760, %v1506_v16  ;;  %v1597_v48 = vand.u32 4294901760, %v1515_v55 }
 0x256   :  { %1868 = vmatpush.msra.mxu2 %v1640_v41 }
 0x257   :  { %1925 = vmatpush.msra.mxu3 %v3567_v19  ;;  %1734 = vmatmul.f32.gmra.mxu0 %v1550_v30  ;;  %v1568_v19 = vsub.f32 %v1566_v1, %v1567_v17  ;;  %v1598_v2 = vsub.f32 %v1515_v55, %v1597_v48  ;;  %v1461_v30 = vpop.permute.xlu2 %1460 }
 0x258   :  { %1872 = vmatpush.msra.mxu2 %v1646_v0  ;;  %1801 = vmatmul.f32.gmra.mxu1 %v1551_v58 }
 0x259   :  { %1927 = vmatpush.msra.mxu3 %v3571_v20  ;;  %v1574_v20 = vsub.f32 %v1506_v16, %v3713_v26  ;;  %v1599_v41 = vand.u32 4294901760, %v1598_v2 }
 0x25a   :  { %1876 = vmatpush.msra.mxu2 %v1652_v46 }
 0x25b   :  { %1929 = vmatpush.msra.mxu3 %v3574_v45  ;;  %v1569_v45 = vand.u32 4294901760, %v1568_v19  ;;  %v1575_v40 = vand.u32 4294901760, %v1574_v20  ;;  %v1600_v29 = vsub.f32 %v1598_v2, %v1599_v41 }
 0x25c   :  { %1880 = vmatpush.msra.mxu2 %v1658_v59  ;;  %1667 = vmatmul.f32.gmra.mxu3 %v3633_v31 }
 0x25d   :  { %1562 = vmatmul.f32.gmra.mxu2 %v1561_v12  ;;  %1931 = vmatpush.msra.mxu3 %v3583_v53  ;;  %v1443_v53 = vld [vmem:[%s4011_s5 + $0x30] sm:$0xff]  ;;  %v1576_v52 = vsub.f32 %v1574_v20, %v1575_v40  ;;  %v1601_v34 = vand.u32 4294901760, %v1600_v29  ;;  %s2529_s5 = smov [#allocation3]  }
 0x25e   :  { %s2406_s1 = sshll.u32 %s2529_s5, 4  ;;  %s2407_s1 = int_to_ptr.vmem [resolvable:$true] %s2406_s1 }
 0x25f   :  { %1933 = vmatpush.msra.mxu3 %v3593_v24  ;;  %1739 = vmatmul.f32.gmra.mxu0 %v1558_v27  ;;  %v1512_v24 = vsel %vm606_vm8, %v1443_v53, 0  ;;  %v1577_v5 = vand.u32 4294901760, %v1576_v52  ;;  %v1476_v27 = vpop.permute.xlu2 %1475 }
 0x260   :  { %1807 = vmatmul.f32.gmra.mxu1 %v1559_v54  ;;  %v1589_v15 = vand.u32 4294901760, %v1512_v24 }
 0x261   :  { %1935 = vmatpush.msra.mxu3 %v3608_v8  ;;  %v1583_v8 = vand.u32 4294901760, %v1582_v23 }
 0x262   :  { %v1590_v51 = vsub.f32 %v1512_v24, %v1589_v15 }
 0x263   :  { %1937 = vmatpush.msra.mxu3 %v3617_v13  ;;  %v1584_v13 = vsub.f32 %v1582_v23, %v1583_v8 }
 0x264   :  { %1671 = vmatmul.f32.gmra.mxu3 %v3674_v9  ;;  %v1591_v63 = vand.u32 4294901760, %v1590_v51 }
 0x265   :  { %1570 = vmatmul.f32.gmra.mxu2 %v1569_v45  ;;  %v1585_v28 = vand.u32 4294901760, %v1584_v13 }
 0x266   :  { %v1592_v50 = vsub.f32 %v1590_v51, %v1591_v63 }
 0x267   :  { %1744 = vmatmul.f32.gmra.mxu0 %v1566_v1 }
 0x268   :  { %1813 = vmatmul.f32.gmra.mxu1 %v1567_v17  ;;  %v1593_v42 = vand.u32 4294901760, %v1592_v50 }
 0x26c   :  { %1675 = vmatmul.f32.gmra.mxu3 %v3694_v3 }
 0x26d   :  { %1578 = vmatmul.f32.gmra.mxu2 %v1577_v5 }
 0x26f   :  { %1749 = vmatmul.f32.gmra.mxu0 %v1574_v20 }
 0x270   :  { %1819 = vmatmul.f32.gmra.mxu1 %v1575_v40 }
 0x274   :  { %1679 = vmatmul.f32.gmra.mxu3 %v3713_v26 }
 0x275   :  { %1586 = vmatmul.f32.gmra.mxu2 %v1585_v28 }
 0x277   :  { %1754 = vmatmul.f32.gmra.mxu0 %v1582_v23 }
 0x278   :  { %1825 = vmatmul.f32.gmra.mxu1 %v1583_v8 }
 0x27c   :  { %1683 = vmatmul.f32.gmra.mxu3 %v1581_v32 }
 0x27d   :  { %1594 = vmatmul.f32.gmra.mxu2 %v1593_v42 }
 0x27f   :  { %1759 = vmatmul.f32.gmra.mxu0 %v1590_v51 }
 0x280   :  { %1831 = vmatmul.f32.gmra.mxu1 %v1591_v63 }
 0x284   :  { %1687 = vmatmul.f32.gmra.mxu3 %v1589_v15 }
 0x285   :  { %1602 = vmatmul.f32.gmra.mxu2 %v1601_v34 }
 0x287   :  { %1764 = vmatmul.f32.gmra.mxu0 %v1598_v2 }
 0x288   :  { %1837 = vmatmul.f32.gmra.mxu1 %v1599_v41 }
 0x28c   :  { %1691 = vmatmul.f32.gmra.mxu3 %v1597_v48 }
 0x28d   :  { %1882 = vmatmul.f32.vlgmr.msra.gmra.mxu2 %v3580_v21 }
 0x294   :  { %1939 = vmatmul.f32.vlgmr.msra.gmra.mxu3 %v3580_v21 }
 0x295   :  { %1886 = vmatmul.f32.gmra.mxu2 %v3633_v31 }
 0x29c   :  { %1943 = vmatmul.f32.gmra.mxu3 %v3633_v31  ;;  %v1456_v31 = vpop.permute.xlu1 %1455 }
 0x29d   :  { %1890 = vmatmul.f32.gmra.mxu2 %v3674_v9 }
 0x2a4   :  { %1947 = vmatmul.f32.gmra.mxu3 %v3674_v9  ;;  %v1471_v9 = vpop.permute.xlu1 %1470 }
 0x2a5   :  { %1894 = vmatmul.f32.gmra.mxu2 %v3694_v3 }
 0x2ac   :  { %1951 = vmatmul.f32.gmra.mxu3 %v3694_v3 }
 0x2ad   :  { %1898 = vmatmul.f32.gmra.mxu2 %v3713_v26 }
 0x2b4   :  { %1955 = vmatmul.f32.gmra.mxu3 %v3713_v26 }
 0x2b5   :  { %1902 = vmatmul.f32.gmra.mxu2 %v1581_v32 }
 0x2bc   :  { %1959 = vmatmul.f32.gmra.mxu3 %v1581_v32 }
 0x2bd   :  { %1906 = vmatmul.f32.gmra.mxu2 %v1589_v15 }
 0x2c4   :  { %1963 = vmatmul.f32.gmra.mxu3 %v1589_v15 }
 0x2c5   :  { %1910 = vmatmul.f32.gmra.mxu2 %v1597_v48 }
 0x2cc   :  { %1967 = vmatmul.f32.gmra.mxu3 %v1597_v48  ;;  %v1730_v35 = vpop.f32.mrf.mxu0 }
 0x2cd   :  { %v1796_v61 = vpop.f32.mrf.mxu1 }
 0x2d0   :  { %v1547_v21 = vpop.f32.mrf.mxu2 }
 0x2d1   :  { %v1548_v0 = vadd.f32 %v1547_v21, %v1456_v31 }
 0x2d4   :  { %v1735_v43 = vpop.f32.mrf.mxu0 }
 0x2d5   :  { %v1802_v3 = vpop.f32.mrf.mxu1 }
 0x2d7   :  { %v1664_v49 = vpop.f32.mrf.mxu3 }
 0x2d8   :  { %v1555_v14 = vpop.f32.mrf.mxu2  ;;  %v1665_v39 = vadd.f32 %v1664_v49, %v1548_v0 }
 0x2d9   :  { %v1556_v47 = vadd.f32 %v1555_v14, %v1461_v30 }
 0x2da   :  { %v1731_v40 = vadd.f32 %v1730_v35, %v1665_v39 }
 0x2dc   :  { %v1740_v17 = vpop.f32.mrf.mxu0  ;;  %v1797_v53 = vadd.f32 %v1796_v61, %v1731_v40 }
 0x2dd   :  { %v1808_v26 = vpop.f32.mrf.mxu1 }
 0x2df   :  { %v1668_v18 = vpop.f32.mrf.mxu3 }
 0x2e0   :  { %v1563_v25 = vpop.f32.mrf.mxu2  ;;  %v1669_v46 = vadd.f32 %v1668_v18, %v1556_v47 }
 0x2e1   :  { %v1564_v59 = vadd.f32 %v1563_v25, %v1466_v62 }
 0x2e2   :  { %v1736_v5 = vadd.f32 %v1735_v43, %v1669_v46 }
 0x2e4   :  { %v1745_v20 = vpop.f32.mrf.mxu0  ;;  %v1803_v51 = vadd.f32 %v1802_v3, %v1736_v5  ;;  %v1486_v3 = vpop.permute.xlu1 %1485 }
 0x2e5   :  { %v1814_v44 = vpop.f32.mrf.mxu1 }
 0x2e7   :  { %v1672_v38 = vpop.f32.mrf.mxu3 }
 0x2e8   :  { %v1571_v57 = vpop.f32.mrf.mxu2  ;;  %v1673_v58 = vadd.f32 %v1672_v38, %v1564_v59 }
 0x2e9   :  { %v1572_v7 = vadd.f32 %v1571_v57, %v1471_v9 }
 0x2ea   :  { %v1741_v2 = vadd.f32 %v1740_v17, %v1673_v58 }
 0x2ec   :  { %v3759_v52 = vpop.f32.mrf.mxu0  ;;  %v1809_v14 = vadd.f32 %v1808_v26, %v1741_v2 }
 0x2ed   :  { %v3763_v33 = vpop.f32.mrf.mxu1 }
 0x2ef   :  { %v1676_v56 = vpop.f32.mrf.mxu3 }
 0x2f0   :  { %v1579_v37 = vpop.f32.mrf.mxu2  ;;  %v1677_v36 = vadd.f32 %v1676_v56, %v1572_v7 }
 0x2f1   :  { %v1580_v4 = vadd.f32 %v1579_v37, %v1476_v27 }
 0x2f2   :  { %v1746_v56 = vadd.f32 %v1745_v20, %v1677_v36 }
 0x2f4   :  { %v3772_v48 = vpop.f32.mrf.mxu0  ;;  %v1815_v26 = vadd.f32 %v1814_v44, %v1746_v56 }
 0x2f5   :  { %v3778_v0 = vpop.f32.mrf.mxu1 }
 0x2f7   :  { %v1680_v11 = vpop.f32.mrf.mxu3 }
 0x2f8   :  { %v1587_v22 = vpop.f32.mrf.mxu2  ;;  %v3747_v54 = vadd.f32 %v1680_v11, %v1580_v4 }
 0x2f9   :  { %v1588_v6 = vadd.f32 %v1587_v22, %v1481_v10 }
 0x2fc   :  { %v1760_v9 = vpop.f32.mrf.mxu0 }
 0x2fd   :  { %v1832_v10 = vpop.f32.mrf.mxu1 }
 0x2ff   :  { %v1684_v1 = vpop.f32.mrf.mxu3 }
 0x300   :  { %v3749_v16 = vpop.f32.mrf.mxu2  ;;  %v3751_v12 = vadd.f32 %v1684_v1, %v1588_v6 }
 0x301   :  { %v1596_v20 = vadd.f32 %v3749_v16, %v1486_v3 }
 0x307   :  { %v3753_v60 = vpop.f32.mrf.mxu3 }
 0x308   :  { %v3755_v19 = vpop.f32.mrf.mxu2 }
 0x30f   :  { %v3757_v45 = vpop.f32.mrf.mxu3 }
 0x310   :  { %v1883_v32 = vpop.f32.mrf.mxu2 }
 0x311   :  { %v1884_v23 = vadd.f32 %v1883_v32, %v1797_v53  ;;  %v1491_v32 = vpop.permute.xlu2 %1490 }
 0x317   :  { %v1940_v24 = vpop.f32.mrf.mxu3 }
 0x318   :  { %v1887_v8 = vpop.f32.mrf.mxu2  ;;  %v3761_v15 = vadd.f32 %v1940_v24, %v1884_v23 }
 0x319   :  { %v1888_v28 = vadd.f32 %v1887_v8, %v1803_v51  ;;  %v1604_v8 = vadd.f32 %v3755_v19, %v1491_v32  ;;  %v1689_v51 = vadd.f32 %v3753_v60, %v1596_v20  ;;  %v1751_v60 = vadd.f32 %v3759_v52, %v3747_v54  ;;  %v1765_v19 = vpop.f32.mrf.mxu0 }
 0x31a   :  { %v3766_v13 = vmul.f32 0.70710677, %v3761_v15  ;;  %v3853_v32 = vmul.f32 0.5, %v3761_v15 }
 0x31b   :  { %v1821_v52 = vadd.f32 %v3763_v33, %v1751_v60 }
 0x31c   :  { %v1987_v55 = vmul.f32 %v3766_v13, %v3766_v13 }
 0x31e   :  { %v3770_v63 = vmin.f32 %v1987_v55, 16.0 }
 0x31f   :  { %v1944_v50 = vpop.f32.mrf.mxu3 }
 0x320   :  { %v1989_v42 = vmul.f32 2.1237322e-06, %v3770_v63  ;;  %v2000_v41 = vmul.f32 3.8918573e-05, %v3770_v63  ;;  %v3776_v29 = vadd.f32 %v1944_v50, %v1888_v28  ;;  %v1891_v34 = vpop.f32.mrf.mxu2 }
 0x321   :  { %v1892_v46 = vadd.f32 %v1891_v34, %v1809_v14 }
 0x322   :  { %v1990_v21 = vadd.f32 0.00028619796, %v1989_v42  ;;  %v2001_v31 = vadd.f32 0.001143296, %v2000_v41  ;;  %v3781_v49 = vmul.f32 0.70710677, %v3776_v29  ;;  %v1693_v42 = vadd.f32 %v3757_v45, %v1604_v8 }
 0x324   :  { %v1991_v39 = vmul.f32 %v1990_v21, %v3770_v63  ;;  %v2002_v30 = vmul.f32 %v2001_v31, %v3770_v63  ;;  %v2027_v47 = vmul.f32 %v3781_v49, %v3781_v49 }
 0x326   :  { %v1992_v18 = vadd.f32 0.0036580483, %v1991_v39  ;;  %v2003_v25 = vadd.f32 0.014752088, %v2002_v30  ;;  %v3787_v62 = vmin.f32 %v2027_v47, 16.0  ;;  %v1756_v30 = vadd.f32 %v3772_v48, %v3751_v12 }
 0x327   :  { %v1948_v59 = vpop.f32.mrf.mxu3  ;;  %v1761_v47 = vadd.f32 %v1760_v9, %v1689_v51 }
 0x328   :  { %v1993_v38 = vmul.f32 %v1992_v18, %v3770_v63  ;;  %v2004_v57 = vmul.f32 %v2003_v25, %v3770_v63  ;;  %v3791_v58 = vadd.f32 %v1948_v59, %v1892_v46  ;;  %v2029_v35 = vmul.f32 2.1237322e-06, %v3787_v62  ;;  %v1895_v43 = vpop.f32.mrf.mxu2 }
 0x329   :  { %v2040_v7 = vmul.f32 3.8918573e-05, %v3787_v62  ;;  %v1896_v28 = vadd.f32 %v1895_v43, %v1815_v26  ;;  %v1766_v59 = vadd.f32 %v1765_v19, %v1693_v42  ;;  %v1827_v9 = vadd.f32 %v3778_v0, %v1756_v30 }
 0x32a   :  { %v1994_v37 = vadd.f32 0.05243302, %v1993_v38  ;;  %v2005_v61 = vadd.f32 0.112945676, %v2004_v57  ;;  %v2030_v27 = vadd.f32 0.00028619796, %v2029_v35  ;;  %v1838_v57 = vpop.f32.mrf.mxu1 }
 0x32b   :  { %v2041_v4 = vadd.f32 0.001143296, %v2040_v7  ;;  %v3796_v11 = vmul.f32 0.70710677, %v3791_v58  ;;  %v3839_v43 = vadd.f32 %v1838_v57, %v1766_v59 }
 0x32c   :  { %v2006_v22 = vmul.f32 %v2005_v61, %v3770_v63  ;;  %v1995_v6 = vmul.f32 %v1994_v37, %v3770_v63  ;;  %v2031_v1 = vmul.f32 %v2030_v27, %v3787_v62  ;;  %v3836_v37 = vadd.f32 %v1832_v10, %v1761_v47 }
 0x32d   :  { %v2042_v17 = vmul.f32 %v2041_v4, %v3787_v62  ;;  %v2067_v36 = vmul.f32 %v3796_v11, %v3796_v11 }
 0x32e   :  { %v2007_v40 = vadd.f32 0.4994258, %v2006_v22  ;;  %v2032_v53 = vadd.f32 0.0036580483, %v2031_v1  ;;  %v1996_v50 = vadd.f32 0.18741608, %v1995_v6 }
 0x32f   :  { %v2043_v23 = vadd.f32 0.014752088, %v2042_v17  ;;  %v3805_v24 = vmin.f32 %v2067_v36, 16.0  ;;  %v1952_v5 = vpop.f32.mrf.mxu3 }
 0x330   :  { %v2008_v55 = vmul.f32 %v2007_v40, %v3770_v63  ;;  %v2033_v2 = vmul.f32 %v2032_v53, %v3787_v62  ;;  %v3817_v21 = vadd.f32 %v1952_v5, %v1896_v28  ;;  %v1997_v45 = vmul.f32 %v1996_v50, %v3770_v63  ;;  %v1899_v46 = vpop.f32.mrf.mxu2 }
 0x331   :  { %v2044_v44 = vmul.f32 %v2043_v23, %v3787_v62  ;;  %v2069_v16 = vmul.f32 2.1237322e-06, %v3805_v24  ;;  %v2080_v34 = vmul.f32 3.8918573e-05, %v3805_v24  ;;  %v1900_v4 = vadd.f32 %v1899_v46, %v1821_v52 }
 0x332   :  { %v3814_v41 = vadd.f32 1.0, %v2008_v55  ;;  %v2034_v31 = vadd.f32 0.05243302, %v2033_v2  ;;  %v3828_v54 = vmul.f32 0.70710677, %v3817_v21 }
 0x333   :  { %v2045_v14 = vadd.f32 0.112945676, %v2044_v44  ;;  %v2070_v39 = vadd.f32 0.00028619796, %v2069_v16  ;;  %v2081_v38 = vadd.f32 0.001143296, %v2080_v34 }
 0x334   :  { %2485 = vrcp.f32 %v3814_v41  ;;  %v2035_v12 = vmul.f32 %v2034_v31, %v3787_v62  ;;  %v2107_v7 = vmul.f32 %v3828_v54, %v3828_v54  ;;  %v1998_v61 = vadd.f32 1.1283791, %v1997_v45 }
 0x335   :  { %v2046_v18 = vmul.f32 %v2045_v14, %v3787_v62  ;;  %v2071_v25 = vmul.f32 %v2070_v39, %v3805_v24  ;;  %v2082_v63 = vmul.f32 %v2081_v38, %v3805_v24  ;;  %v2019_v5 = vand.u32 2147483647, %v3814_v41 }
 0x336   :  { %v3842_v0 = vmin.f32 %v2107_v7, 16.0  ;;  %v2036_v1 = vadd.f32 0.18741608, %v2035_v12  ;;  %v1999_v53 = vmul.f32 %v1998_v61, %v3766_v13  ;;  %v2021_v8 = vand.u32 2147483648, %v3814_v41 }
 0x337   :  { %v2047_v48 = vadd.f32 0.4994258, %v2046_v18  ;;  %v2072_v35 = vadd.f32 0.0036580483, %v2071_v25  ;;  %v1956_v56 = vpop.f32.mrf.mxu3  ;;  %v2083_v3 = vadd.f32 0.014752088, %v2082_v63  ;;  %vm2015_vm3 = vweird.f32 %v3814_v41 }
 0x338   :  { %v3847_v36 = vadd.f32 %v1956_v56, %v1900_v4  ;;  %v2109_v20 = vmul.f32 2.1237322e-06, %v3842_v0  ;;  %v2120_v40 = vmul.f32 3.8918573e-05, %v3842_v0  ;;  %v1903_v2 = vpop.f32.mrf.mxu2  ;;  %v2037_v15 = vmul.f32 %v2036_v1, %v3787_v62 }
 0x339   :  { %v2048_v27 = vmul.f32 %v2047_v48, %v3787_v62  ;;  %v2073_v22 = vmul.f32 %v2072_v35, %v3805_v24  ;;  %v2084_v26 = vmul.f32 %v2083_v3, %v3805_v24  ;;  %vm2020_vm7 = vcmp.eq.f32.partialorder %v2019_v5, 8.507059e+37 }
 0x33a   :  { %v2486_v33 = vpop.eup %2485  ;;  %v2110_v28 = vadd.f32 0.00028619796, %v2109_v20  ;;  %v2121_v50 = vadd.f32 0.001143296, %v2120_v40  ;;  %v3860_v44 = vmul.f32 0.70710677, %v3847_v36 }
 0x33b   :  { %v2011_v6 = vmul.f32 %v2486_v33, %v3814_v41  ;;  %v3845_v17 = vadd.f32 1.0, %v2048_v27  ;;  %v2074_v10 = vadd.f32 0.05243302, %v2073_v22  ;;  %vm2016_vm8 = vweird.f32 %v2486_v33 }
 0x33c   :  { %v2085_v51 = vadd.f32 0.112945676, %v2084_v26  ;;  %v2111_v34 = vmul.f32 %v2110_v28, %v3842_v0  ;;  %v2122_v60 = vmul.f32 %v2121_v50, %v3842_v0  ;;  %v2147_v19 = vmul.f32 %v3860_v44, %v3860_v44  ;;  %vm2017_vm5 = vmor %vm2015_vm3, %vm2016_vm8 }
 0x33d   :  { %v2012_v23 = vsub.f32 1.0, %v2011_v6  ;;  %2487 = vrcp.f32 %v3845_v17  ;;  %v2075_v13 = vmul.f32 %v2074_v10, %v3805_v24  ;;  %v2022_v31 = vor.u32 1.1754944e-38, %v2021_v8 }
 0x33e   :  { %v2086_v16 = vmul.f32 %v2085_v51, %v3805_v24  ;;  %v1904_v41 = vadd.f32 %v1903_v2, %v1827_v9  ;;  %v2112_v30 = vadd.f32 0.0036580483, %v2111_v34  ;;  %v2123_v47 = vadd.f32 0.014752088, %v2122_v60 }
 0x33f   :  { %v2013_v55 = vmul.f32 %v2486_v33, %v2012_v23  ;;  %v3871_v45 = vmin.f32 %v2147_v19, 16.0  ;;  %v2038_v25 = vadd.f32 1.1283791, %v2037_v15  ;;  %v2059_v59 = vand.u32 2147483647, %v3845_v17  ;;  %v1960_v38 = vpop.f32.mrf.mxu3 }
 0x340   :  { %v2087_v14 = vadd.f32 0.4994258, %v2086_v16  ;;  %v2076_v57 = vadd.f32 0.18741608, %v2075_v13  ;;  %v2124_v48 = vmul.f32 %v2123_v47, %v3842_v0  ;;  %v2113_v35 = vmul.f32 %v2112_v30, %v3842_v0  ;;  %v1907_v51 = vpop.f32.mrf.mxu2 }
 0x341   :  { %v2014_v42 = vadd.f32 %v2486_v33, %v2013_v55  ;;  %v2149_v63 = vmul.f32 2.1237322e-06, %v3871_v45  ;;  %v2160_v7 = vmul.f32 3.8918573e-05, %v3871_v45  ;;  %v2061_v56 = vand.u32 2147483648, %v3845_v17 }
 0x342   :  { %v2088_v12 = vmul.f32 %v2087_v14, %v3805_v24  ;;  %v2125_v27 = vadd.f32 0.112945676, %v2124_v48  ;;  %v1972_v6 = vmul.f32 0.5, %v3776_v29  ;;  %vm2055_vm10 = vweird.f32 %v3845_v17 }
 0x343   :  { %v2488_v39 = vpop.eup %2487  ;;  %v2018_v62 = vsel %vm2017_vm5, %v2486_v33, %v2014_v42  ;;  %v2150_v22 = vadd.f32 0.00028619796, %v2149_v63  ;;  %v2161_v3 = vadd.f32 0.001143296, %v2160_v7  ;;  %v2077_v1 = vmul.f32 %v2076_v57, %v3805_v24 }
 0x344   :  { %v2023_v18 = vsel %vm2020_vm7, %v2022_v31, %v2018_v62  ;;  %v2051_v46 = vmul.f32 %v2488_v39, %v3845_v17  ;;  %vm2056_vm9 = vweird.f32 %v2488_v39  ;;  %v3881_v61 = vadd.f32 1.0, %v2088_v12 }
 0x345   :  { %v2024_v52 = vmul.f32 %v2023_v18, %v1999_v53  ;;  %v2114_v26 = vadd.f32 0.05243302, %v2113_v35  ;;  %v2126_v20 = vmul.f32 %v2125_v27, %v3842_v0  ;;  %v3888_v40 = vadd.f32 %v1960_v38, %v1904_v41  ;;  %vm2057_vm11 = vmor %vm2055_vm10, %vm2056_vm9  ;;  %v2339_v35 = vpop.permute.xlu1 %2338 }
 0x346   :  { %v2052_v9 = vsub.f32 1.0, %v2051_v46  ;;  %2489 = vrcp.f32 %v3881_v61  ;;  %v2039_v53 = vmul.f32 %v2038_v25, %v3781_v49  ;;  %v2062_v23 = vor.u32 1.1754944e-38, %v2061_v56 }
 0x347   :  { %v2433_v4 = vclamps-f32 %v2024_v52, 1.0  ;;  %v2151_v5 = vmul.f32 %v2150_v22, %v3871_v45  ;;  %v2162_v29 = vmul.f32 %v2161_v3, %v3871_v45  ;;  %vm2060_vm12 = vcmp.eq.f32.partialorder %v2059_v59, 8.507059e+37  ;;  %v1964_v42 = vpop.f32.mrf.mxu3  ;;  %v2334_v52 = vpop.permute.xlu0 %2333 }
 0x348   :  { %v2053_v33 = vmul.f32 %v2488_v39, %v2052_v9  ;;  %v2127_v24 = vadd.f32 0.4994258, %v2126_v20  ;;  %v2078_v28 = vadd.f32 1.1283791, %v2077_v1  ;;  %v2115_v13 = vmul.f32 %v2114_v26, %v3842_v0 }
 0x349   :  { %v2307_v17 = vadd.f32 1.0, %v2433_v4  ;;  %v2152_v50 = vadd.f32 0.0036580483, %v2151_v5  ;;  %v2163_v2 = vadd.f32 0.014752088, %v2162_v29  ;;  %v3900_v60 = vmul.f32 0.5, %v3791_v58 }
 0x34a   :  { %v2054_v10 = vadd.f32 %v2488_v39, %v2053_v33  ;;  %v2128_v49 = vmul.f32 %v2127_v24, %v3842_v0  ;;  %v3897_v16 = vmul.f32 0.70710677, %v3888_v40  ;;  %v2099_v19 = vand.u32 2147483647, %v3881_v61 }
 0x34b   :  { %v2164_v31 = vmul.f32 %v2163_v2, %v3871_v45  ;;  %v1908_v14 = vadd.f32 %v1907_v51, %v3836_v37  ;;  %v2315_v41 = vmul.f32 %v2307_v17, %v3853_v32  ;;  %v2153_v30 = vmul.f32 %v2152_v50, %v3871_v45 }
 0x34c   :  { %v2058_v8 = vsel %vm2057_vm11, %v2488_v39, %v2054_v10  ;;  %v2490_v34 = vpop.eup %2489  ;;  %v3908_v47 = vadd.f32 1.0, %v2128_v49  ;;  %v2187_v58 = vmul.f32 %v3897_v16, %v3897_v16  ;;  %v2079_v59 = vmul.f32 %v2078_v28, %v3796_v11  ;;  %v1911_v10 = vpop.f32.mrf.mxu2 }
 0x34d   :  { %v2063_v55 = vsel %vm2060_vm12, %v2062_v23, %v2058_v8  ;;  %v2091_v62 = vmul.f32 %v2490_v34, %v3881_v61  ;;  %v2165_v18 = vadd.f32 0.112945676, %v2164_v31  ;;  %v3912_v25 = vadd.f32 %v1964_v42, %v1908_v14 }
 0x34e   :  { %v2064_v15 = vmul.f32 %v2063_v55, %v2039_v53  ;;  %v2116_v37 = vadd.f32 0.18741608, %v2115_v13  ;;  %vm2095_vm13 = vweird.f32 %v3881_v61  ;;  %vm2096_vm14 = vweird.f32 %v2490_v34 }
 0x34f   :  { %v2092_v38 = vsub.f32 1.0, %v2091_v62  ;;  %v2101_v32 = vand.u32 2147483648, %v3881_v61  ;;  %2491 = vrcp.f32 %v3908_v47  ;;  %v2154_v48 = vadd.f32 0.05243302, %v2153_v30  ;;  %vm2097_vm1 = vmor %vm2095_vm13, %vm2096_vm14  ;;  %v1968_v50 = vpop.f32.mrf.mxu3 }
 0x350   :  { %v2434_v39 = vclamps-f32 %v2064_v15, 1.0  ;;  %v2166_v9 = vmul.f32 %v2165_v18, %v3871_v45  ;;  %v2371_v63 = vmul.f32 %v2334_v52, %v2315_v41  ;;  %vm3919_vm15 = vcmp.eq.f32.partialorder %v2099_v19, 8.507059e+37  ;;  %v2344_v52 = vpop.permute.xlu2 %2343 }
 0x351   :  { %v2093_v12 = vmul.f32 %v2490_v34, %v2092_v38  ;;  %v3923_v11 = vmin.f32 %v2187_v58, 16.0  ;;  %v3926_v56 = vmul.f32 0.70710677, %v3912_v25  ;;  %v2117_v33 = vmul.f32 %v2116_v37, %v3842_v0 }
 0x352   :  { %v2308_v46 = vadd.f32 1.0, %v2434_v39  ;;  %v2167_v22 = vadd.f32 0.4994258, %v2166_v9  ;;  %v2102_v3 = vor.u32 1.1754944e-38, %v2101_v32  ;;  %v2155_v23 = vmul.f32 %v2154_v48, %v3871_v45 }
 0x353   :  { %v2094_v4 = vadd.f32 %v2490_v34, %v2093_v12  ;;  %v2200_v1 = vmul.f32 3.8918573e-05, %v3923_v11  ;;  %v2227_v26 = vmul.f32 %v3926_v56, %v3926_v56  ;;  %v2118_v51 = vadd.f32 1.1283791, %v2117_v33 }
 0x354   :  { %v2316_v57 = vmul.f32 %v2308_v46, %v1972_v6  ;;  %v2189_v6 = vmul.f32 2.1237322e-06, %v3923_v11  ;;  %v2168_v0 = vmul.f32 %v2167_v22, %v3871_v45  ;;  %v1912_v28 = vadd.f32 %v1911_v10, %v3839_v43 }
 0x355   :  { %v2098_v53 = vsel %vm2097_vm1, %v2490_v34, %v2094_v4  ;;  %v2492_v5 = vpop.eup %2491  ;;  %v2201_v17 = vadd.f32 0.001143296, %v2200_v1  ;;  %v3940_v8 = vmin.f32 %v2227_v26, 16.0  ;;  %v2139_v2 = vand.u32 2147483647, %v3908_v47 }
 0x356   :  { %v2372_v27 = vmul.f32 %v2339_v35, %v2316_v57  ;;  %v2103_v61 = vsel %vm3919_vm15, %v2102_v3, %v2098_v53  ;;  %v2190_v29 = vadd.f32 0.00028619796, %v2189_v6  ;;  %v2131_v55 = vmul.f32 %v2492_v5, %v3908_v47 }
 0x357   :  { %v2104_v24 = vmul.f32 %v2103_v61, %v2079_v59  ;;  %v3945_v15 = vadd.f32 1.0, %v2168_v0  ;;  %v2202_v49 = vmul.f32 %v2201_v17, %v3923_v11  ;;  %v2141_v19 = vand.u32 2147483648, %v3908_v47 }
 0x358   :  { %v2379_v20 = vadd.f32 %v2372_v27, %v2371_v63  ;;  %v2191_v13 = vmul.f32 %v2190_v29, %v3923_v11  ;;  %v2132_v34 = vsub.f32 1.0, %v2131_v55  ;;  %v2240_v31 = vmul.f32 3.8918573e-05, %v3940_v8 }
 0x359   :  { %v2435_v42 = vclamps-f32 %v2104_v24, 1.0  ;;  %v2156_v14 = vadd.f32 0.18741608, %v2155_v23  ;;  %2493 = vrcp.f32 %v3945_v15  ;;  %v2229_v43 = vmul.f32 2.1237322e-06, %v3940_v8 }
 0x35a   :  { %v3953_v41 = vadd.f32 %v1968_v50, %v1912_v28  ;;  %v2133_v62 = vmul.f32 %v2492_v5, %v2132_v34  ;;  %vm2136_vm4 = vweird.f32 %v2492_v5  ;;  %v2203_v30 = vadd.f32 0.014752088, %v2202_v49 }
 0x35b   :  { %v2309_v39 = vadd.f32 1.0, %v2435_v42  ;;  %v2119_v18 = vmul.f32 %v2118_v51, %v3828_v54  ;;  %vm2135_vm6 = vweird.f32 %v3908_v47  ;;  %v2192_v58 = vadd.f32 0.0036580483, %v2191_v13  ;;  %v2349_v42 = vpop.permute.xlu0 %2348 }
 0x35c   :  { %v2241_v46 = vadd.f32 0.001143296, %v2240_v31  ;;  %v2134_v38 = vadd.f32 %v2492_v5, %v2133_v62  ;;  %v2142_v37 = vor.u32 1.1754944e-38, %v2141_v19  ;;  %v2204_v32 = vmul.f32 %v2203_v30, %v3923_v11  ;;  %vm2137_vm0 = vmor %vm2135_vm6, %vm2136_vm4 }
 0x35d   :  { %v2317_v59 = vmul.f32 %v2309_v39, %v3900_v60  ;;  %v2157_v57 = vmul.f32 %v2156_v14, %v3871_v45  ;;  %v2230_v12 = vadd.f32 0.00028619796, %v2229_v43  ;;  %v3962_v9 = vmul.f32 0.70710677, %v3953_v41 }
 0x35e   :  { %v2242_v48 = vmul.f32 %v2241_v46, %v3940_v8  ;;  %v2138_v47 = vsel %vm2137_vm0, %v2492_v5, %v2134_v38  ;;  %vm2140_vm2 = vcmp.eq.f32.partialorder %v2139_v2, 8.507059e+37  ;;  %v2205_v35 = vadd.f32 0.112945676, %v2204_v32 }
 0x35f   :  { %v2373_v54 = vmul.f32 %v2344_v52, %v2317_v59  ;;  %v2494_v63 = vpop.eup %2493  ;;  %v2143_v60 = vsel %vm2140_vm2, %v2142_v37, %v2138_v47  ;;  %v2193_v7 = vmul.f32 %v2192_v58, %v3923_v11  ;;  %v2267_v4 = vmul.f32 %v3962_v9, %v3962_v9 }
 0x360   :  { %v2243_v27 = vadd.f32 0.014752088, %v2242_v48  ;;  %v2144_v45 = vmul.f32 %v2143_v60, %v2119_v18  ;;  %v2171_v22 = vmul.f32 %v2494_v63, %v3945_v15  ;;  %v2158_v3 = vadd.f32 1.1283791, %v2157_v57 }
 0x361   :  { %v2380_v33 = vadd.f32 %v2379_v20, %v2373_v54  ;;  %v2206_v6 = vmul.f32 %v2205_v35, %v3923_v11  ;;  %v2231_v1 = vmul.f32 %v2230_v12, %v3940_v8  ;;  %v2179_v23 = vand.u32 2147483647, %v3945_v15 }
 0x362   :  { %v2244_v10 = vmul.f32 %v2243_v27, %v3940_v8  ;;  %v2436_v26 = vclamps-f32 %v2144_v45, 1.0  ;;  %v2172_v53 = vsub.f32 1.0, %v2171_v22  ;;  %v3972_v0 = vmin.f32 %v2267_v4, 16.0 }
 0x363   :  { %v1974_v5 = vmul.f32 0.5, %v3817_v21  ;;  %v2181_v20 = vand.u32 2147483648, %v3945_v15  ;;  %v2194_v61 = vadd.f32 0.05243302, %v2193_v7  ;;  %v2207_v29 = vadd.f32 0.4994258, %v2206_v6  ;;  %v2354_v7 = vpop.permute.xlu1 %2353 }
 0x364   :  { %v2310_v17 = vadd.f32 1.0, %v2436_v26  ;;  %v2173_v24 = vmul.f32 %v2494_v63, %v2172_v53  ;;  %vm2176_vm8 = vweird.f32 %v2494_v63  ;;  %v2245_v51 = vadd.f32 0.112945676, %v2244_v10 }
 0x365   :  { %v2159_v55 = vmul.f32 %v2158_v3, %v3860_v44  ;;  %vm2175_vm3 = vweird.f32 %v3945_v15  ;;  %v2208_v28 = vmul.f32 %v2207_v29, %v3923_v11  ;;  %v2232_v50 = vadd.f32 0.0036580483, %v2231_v1 }
 0x366   :  { %v2318_v2 = vmul.f32 %v2310_v17, %v1974_v5  ;;  %v2174_v13 = vadd.f32 %v2494_v63, %v2173_v24  ;;  %v2246_v49 = vmul.f32 %v2245_v51, %v3940_v8  ;;  %v2269_v21 = vmul.f32 2.1237322e-06, %v3972_v0  ;;  %vm2177_vm5 = vmor %vm2175_vm3, %vm2176_vm8 }
 0x367   :  { %v2182_v34 = vor.u32 1.1754944e-38, %v2181_v20  ;;  %v2195_v19 = vmul.f32 %v2194_v61, %v3923_v11  ;;  %v2209_v31 = vadd.f32 1.0, %v2208_v28  ;;  %v2280_v14 = vmul.f32 3.8918573e-05, %v3972_v0 }
 0x368   :  { %v2374_v44 = vmul.f32 %v2349_v42, %v2318_v2  ;;  %v2178_v43 = vsel %vm2177_vm5, %v2494_v63, %v2174_v13  ;;  %vm2180_vm7 = vcmp.eq.f32.partialorder %v2179_v23, 8.507059e+37  ;;  %v2247_v15 = vadd.f32 0.4994258, %v2246_v49 }
 0x369   :  { %v2183_v39 = vsel %vm2180_vm7, %v2182_v34, %v2178_v43  ;;  %2495 = vrcp.f32 %v2209_v31  ;;  %v2233_v62 = vmul.f32 %v2232_v50, %v3940_v8  ;;  %v2270_v58 = vadd.f32 0.00028619796, %v2269_v21 }
 0x36a   :  { %v2381_v30 = vadd.f32 %v2380_v33, %v2374_v44  ;;  %v2184_v18 = vmul.f32 %v2183_v39, %v2159_v55  ;;  %v2196_v46 = vadd.f32 0.18741608, %v2195_v19  ;;  %v2248_v59 = vmul.f32 %v2247_v15, %v3940_v8 }
 0x36b   :  { %v2281_v38 = vadd.f32 0.001143296, %v2280_v14  ;;  %v2234_v32 = vadd.f32 0.05243302, %v2233_v62  ;;  %v1975_v12 = vmul.f32 0.5, %v3847_v36  ;;  %v2271_v54 = vmul.f32 %v2270_v58, %v3972_v0 }
 0x36c   :  { %v2437_v37 = vclamps-f32 %v2184_v18, 1.0  ;;  %v2249_v52 = vadd.f32 1.0, %v2248_v59  ;;  %v2197_v35 = vmul.f32 %v2196_v46, %v3923_v11  ;;  %v2221_v6 = vand.u32 2147483648, %v2209_v31  ;;  %v2359_v18 = vpop.permute.xlu2 %2358 }
 0x36d   :  { %v2282_v57 = vmul.f32 %v2281_v38, %v3972_v0  ;;  %v2235_v27 = vmul.f32 %v2234_v32, %v3940_v8  ;;  %v2272_v22 = vadd.f32 0.0036580483, %v2271_v54  ;;  %v2219_v26 = vand.u32 2147483647, %v2209_v31 }
 0x36e   :  { %v2311_v48 = vadd.f32 1.0, %v2437_v37  ;;  %2497 = vrcp.f32 %v2249_v52  ;;  %v2198_v3 = vadd.f32 1.1283791, %v2197_v35  ;;  %vm2215_vm10 = vweird.f32 %v2209_v31 }
 0x36f   :  { %v2496_v47 = vpop.eup %2495  ;;  %v2283_v4 = vadd.f32 0.014752088, %v2282_v57  ;;  %v2236_v11 = vadd.f32 0.18741608, %v2235_v27  ;;  %v2273_v61 = vmul.f32 %v2272_v22, %v3972_v0  ;;  %v2222_v29 = vor.u32 1.1754944e-38, %v2221_v6  ;;  %v2364_v6 = vpop.permute.xlu0 %2363 }
 0x370   :  { %v2319_v63 = vmul.f32 %v2311_v48, %v1975_v12  ;;  %v2211_v60 = vmul.f32 %v2496_v47, %v2209_v31  ;;  %vm2216_vm9 = vweird.f32 %v2496_v47  ;;  %v2199_v24 = vmul.f32 %v2198_v3, %v3897_v16 }
 0x371   :  { %v2284_v36 = vmul.f32 %v2283_v4, %v3972_v0  ;;  %vm2217_vm11 = vmor %vm2215_vm10, %vm2216_vm9  ;;  %vm2220_vm12 = vcmp.eq.f32.partialorder %v2219_v26, 8.507059e+37  ;;  %v2237_v50 = vmul.f32 %v2236_v11, %v3940_v8  ;;  %v2274_v21 = vadd.f32 0.05243302, %v2273_v61 }
 0x372   :  { %v2375_v33 = vmul.f32 %v2354_v7, %v2319_v63  ;;  %v2212_v45 = vsub.f32 1.0, %v2211_v60  ;;  %v2261_v42 = vand.u32 2147483648, %v2249_v52  ;;  %vm2255_vm14 = vweird.f32 %v2249_v52 }
 0x373   :  { %v2285_v23 = vadd.f32 0.112945676, %v2284_v36  ;;  %v2259_v14 = vand.u32 2147483647, %v2249_v52  ;;  %v1976_v16 = vmul.f32 0.5, %v3888_v40  ;;  %v2275_v8 = vmul.f32 %v2274_v21, %v3972_v0 }
 0x374   :  { %v2382_v1 = vadd.f32 %v2381_v30, %v2375_v33  ;;  %v2213_v10 = vmul.f32 %v2496_v47, %v2212_v45  ;;  %v2498_v53 = vpop.eup %2497  ;;  %v2238_v15 = vadd.f32 1.1283791, %v2237_v50  ;;  %v2262_v62 = vor.u32 1.1754944e-38, %v2261_v42 }
 0x375   :  { %v2251_v20 = vmul.f32 %v2498_v53, %v2249_v52  ;;  %v2286_v17 = vmul.f32 %v2285_v23, %v3972_v0  ;;  %vm2256_vm13 = vweird.f32 %v2498_v53  ;;  %vm2260_vm1 = vcmp.eq.f32.partialorder %v2259_v14, 8.507059e+37 }
 0x376   :  { %v2214_v5 = vadd.f32 %v2496_v47, %v2213_v10  ;;  %vm2257_vm15 = vmor %vm2255_vm14, %vm2256_vm13  ;;  %v2239_v59 = vmul.f32 %v2238_v15, %v3926_v56  ;;  %v2276_v38 = vadd.f32 0.18741608, %v2275_v8  ;;  %v1977_v56 = vmul.f32 0.5, %v3912_v25 }
 0x377   :  { %v2252_v55 = vsub.f32 1.0, %v2251_v20  ;;  %v2287_v2 = vadd.f32 0.4994258, %v2286_v17 }
 0x378   :  { %v2218_v51 = vsel %vm2217_vm11, %v2496_v47, %v2214_v5  ;;  %v2277_v52 = vmul.f32 %v2276_v38, %v3972_v0 }
 0x379   :  { %v2223_v28 = vsel %vm2220_vm12, %v2222_v29, %v2218_v51  ;;  %v2253_v49 = vmul.f32 %v2498_v53, %v2252_v55  ;;  %v2288_v34 = vmul.f32 %v2287_v2, %v3972_v0  ;;  %v2396_v29 = vpop.permute.xlu2 %2395 }
 0x37a   :  { %v2224_v13 = vmul.f32 %v2223_v28, %v2199_v24  ;;  %v2278_v47 = vadd.f32 1.1283791, %v2277_v52  ;;  %v2398_v24 = vperm.slane %v2396_v29, 0 }
 0x37b   :  { %v2254_v31 = vadd.f32 %v2498_v53, %v2253_v49  ;;  %v2289_v44 = vadd.f32 1.0, %v2288_v34 }
 0x37c   :  { %v2438_v19 = vclamps-f32 %v2224_v13, 1.0  ;;  %v2279_v4 = vmul.f32 %v2278_v47, %v3962_v9 }
 0x37d   :  { %v2258_v39 = vsel %vm2257_vm15, %v2498_v53, %v2254_v31  ;;  %2499 = vrcp.f32 %v2289_v44  ;;  %v2301_v54 = vand.u32 2147483648, %v2289_v44  ;;  %v2299_v63 = vand.u32 2147483647, %v2289_v44  ;;  %v2369_v53 = vpop.permute.xlu1 %2368 }
 0x37e   :  { %v2312_v43 = vadd.f32 1.0, %v2438_v19  ;;  %v2263_v58 = vsel %vm2260_vm1, %v2262_v62, %v2258_v39  ;;  %vm2295_vm6 = vweird.f32 %v2289_v44 }
 0x37f   :  { %v2264_v32 = vmul.f32 %v2263_v58, %v2239_v59  ;;  %v2302_v27 = vor.u32 1.1754944e-38, %v2301_v54  ;;  %vm2300_vm2 = vcmp.eq.f32.partialorder %v2299_v63, 8.507059e+37 }
 0x380   :  { %v2320_v30 = vmul.f32 %v2312_v43, %v1976_v16 }
 0x381   :  { %v2439_v12 = vclamps-f32 %v2264_v32, 1.0 }
 0x382   :  { %v2376_v46 = vmul.f32 %v2359_v18, %v2320_v30 }
 0x383   :  { %v2500_v40 = vpop.eup %2499  ;;  %v2313_v60 = vadd.f32 1.0, %v2439_v12 }
 0x384   :  { %v2383_v37 = vadd.f32 %v2382_v1, %v2376_v46  ;;  %v2291_v57 = vmul.f32 %v2500_v40, %v2289_v44  ;;  %vm2296_vm4 = vweird.f32 %v2500_v40  ;;  %v1978_v1 = vmul.f32 0.5, %v3953_v41 }
 0x385   :  { %vm2297_vm0 = vmor %vm2295_vm6, %vm2296_vm4  ;;  %v2321_v45 = vmul.f32 %v2313_v60, %v1977_v56 }
 0x386   :  { %v2292_v48 = vsub.f32 1.0, %v2291_v57 }
 0x387   :  { %v2377_v36 = vmul.f32 %v2364_v6, %v2321_v45 }
 0x388   :  { %v2293_v35 = vmul.f32 %v2500_v40, %v2292_v48 }
 0x389   :  { %v2384_v11 = vadd.f32 %v2383_v37, %v2377_v36 }
 0x38a   :  { %v2294_v7 = vadd.f32 %v2500_v40, %v2293_v35 }
 0x38c   :  { %v2298_v33 = vsel %vm2297_vm0, %v2500_v40, %v2294_v7 }
 0x38d   :  { %v2303_v0 = vsel %vm2300_vm2, %v2302_v27, %v2298_v33 }
 0x38e   :  { %v2304_v22 = vmul.f32 %v2303_v0, %v2279_v4 }
 0x390   :  { %v2440_v3 = vclamps-f32 %v2304_v22, 1.0 }
 0x392   :  { %v2314_v10 = vadd.f32 1.0, %v2440_v3 }
 0x394   :  { %v2322_v26 = vmul.f32 %v2314_v10, %v1978_v1 }
 0x396   :  { %v2378_v23 = vmul.f32 %v2369_v53, %v2322_v26 }
 0x398   :  { %v2385_v5 = vadd.f32 %v2384_v11, %v2378_v23 }
 0x39a   :  { %v2386_v20 = vrot.slane %v2385_v5, 4 }
 0x39c   :  { %v2387_v25 = vadd.f32 %v2386_v20, %v2385_v5 }
 0x39e   :  { %v2388_v61 = vrot.slane %v2387_v25, 2 }
 0x3a0   :  { %v2389_v9 = vadd.f32 %v2388_v61, %v2387_v25 }
 0x3a2   :  { %v2390_v17 = vrot.slane %v2389_v9, 1 }
 0x3a4   :  { %v2391_v41 = vadd.f32 %v2390_v17, %v2389_v9 }
 0x3a6   :  { %v2399_v51 = vadd.f32 %v2398_v24, %v2391_v41 }
 0x3a8   :  { %2400 = vst [vmem:[#allocation3] sm:$0x1] %v2399_v51 }
 0x3a9   :  { %2411 = dma.vmem_to_hbm [thread:$0]  %s2407_s1, 16, %s2409_s22, [#allocation4]  }
 0x3aa   :  { %2525 = dma.done.wait [#allocation4], 16  }
 0x3ab   :  { %2526 = vsyncadd [#allocation4], 4294967280 }
 0x3ac   :  { %2416 = vsyncpa [#allocation4], 1 }

</bundles_post_ra>
